<compile_context>
chip_gen: v5e
topology: v5e:2x2
jax: 0.10.0
libtpu: 0.0.40
codegen_flags: <defaults>
</compile_context>

<pallas_src>
import functools

import jax
import jax.numpy as jnp
from jax import lax
from jax.experimental import pallas as pl
from jax.experimental.pallas import tpu as pltpu


# ----------------------------------------------------------------------------
# Fused unrolled-PGD kernel.  All unrolls of
#     x <- x + step * (A^H A x - ATy)                      (MXU)
#     x <- x + W2_bd @ gelu(W1_bd @ x + cond)              (MXU + VPU/EUP)
# with x carried as a value (vreg-resident) across the whole loop.
# ----------------------------------------------------------------------------
def _pgd_fused_kernel(step_ref, x0_ref, a_ref, w1_ref, w2_ref, cond_ref,
                      out_ref, *scratch, use_gram):
    U = w1_ref.shape[0]                  # num_unrolls
    step = step_ref[0]                   # SMEM scalar

    a_bf = a_ref[...]                    # (M, N) bf16, loaded once (hoisted)
    aty = x0_ref[...]                    # (R, N) f32; ATy = x0
    x = aty                              # xi, carried as a value across unrolls

    if use_gram:
        # One-time Gram matrix G = A^T A, reused by every unroll (only taken
        # when 2*U*R > M so it is a FLOP win, and when it fits VMEM).
        g_ref = scratch[0]
        g_ref[...] = lax.dot_general(
            a_bf, a_bf, (((0,), (0,)), ((), ())),          # contract over M
            preferred_element_type=jnp.float32).astype(jnp.bfloat16)

    for u in range(U):                   # static unroll (small, fixed)
        # ---- data-consistency update: x <- x + step * (A^H A x - ATy) ------
        x_bf = x.astype(jnp.bfloat16)
        if use_gram:
            ahax = jnp.dot(x_bf, g_ref[...],
                           preferred_element_type=jnp.float32)          # (R, N)
        else:
            ax = lax.dot_general(x_bf, a_bf, (((1,), (1,)), ((), ())),
                                 preferred_element_type=jnp.float32)    # (R, M)
            ahax = jnp.dot(ax.astype(jnp.bfloat16), a_bf,
                           preferred_element_type=jnp.float32)          # (R, N)
        x = x + step * (ahax - aty)

        # ---- NN regularizer (LatteNet stand-in): conditioned residual MLP --
        # Both channel mixes are MXU matmuls over block-diagonal (per-batch)
        # weights; the conditioning column broadcasts implicitly along lanes.
        h = jnp.dot(w1_ref[u].astype(jnp.bfloat16), x.astype(jnp.bfloat16),
                    preferred_element_type=jnp.float32) + cond_ref[u]   # (B*F, N)
        h = jax.nn.gelu(h)
        x = x + jnp.dot(w2_ref[u].astype(jnp.bfloat16),
                        h.astype(jnp.bfloat16),
                        preferred_element_type=jnp.float32)             # (R, N)

    out_ref[...] = x.astype(out_ref.dtype)


def pgd_forward(step_size, x_flat, a_bf16, w1_bd, w2_bd, cond_bd, *,
                use_gram=None):
    R, N = x_flat.shape
    M = a_bf16.shape[0]
    U = w1_bd.shape[0]

    try:
        vmem_cap = int(pltpu.get_tpu_info().vmem_capacity_bytes)
    except Exception:
        vmem_cap = 64 * 1024 * 1024      # v7x floor (smallest of v5e/v6e/v7x)

    base_bytes = (2 * R * N * 4          # x0 in + out (f32)
                  + M * N * 2            # A (bf16)
                  + w1_bd.size * 4 + w2_bd.size * 4 + cond_bd.size * 4)
    gram_bytes = N * N * 2               # G (bf16)

    if use_gram is None:
        # Gram only pays off when the per-unroll LHS rows amortize building
        # A^T A, and only when the (N, N) bf16 G actually fits in VMEM.
        use_gram = (2 * U * R > M) and (base_bytes + gram_bytes) < int(0.8 * vmem_cap)

    needed = base_bytes + (gram_bytes if use_gram else 0)
    vmem_limit = int(min(vmem_cap, max(2 * needed, 32 * 1024 * 1024)))

    scratch_shapes = [pltpu.VMEM((N, N), jnp.bfloat16)] if use_gram else []
    kernel = functools.partial(_pgd_fused_kernel, use_gram=use_gram)

    return pl.pallas_call(
        kernel,
        out_shape=jax.ShapeDtypeStruct((R, N), x_flat.dtype),
        in_specs=[
            pl.BlockSpec(memory_space=pltpu.MemorySpace.SMEM),   # step_size (1,)
            pl.BlockSpec(memory_space=pltpu.MemorySpace.VMEM),   # x0 / ATy  [R, N] f32
            pl.BlockSpec(memory_space=pltpu.MemorySpace.VMEM),   # A         [M, N] bf16
            pl.BlockSpec(memory_space=pltpu.MemorySpace.VMEM),   # W1 blkdiag [U, B*F, B*C]
            pl.BlockSpec(memory_space=pltpu.MemorySpace.VMEM),   # W2 blkdiag [U, B*C, B*F]
            pl.BlockSpec(memory_space=pltpu.MemorySpace.VMEM),   # cond       [U, B*F, 1]
        ],
        out_specs=pl.BlockSpec(memory_space=pltpu.MemorySpace.VMEM),
        scratch_shapes=scratch_shapes,
        input_output_aliases={1: 0},                 # output reuses x0's HBM buffer
        compiler_params=pltpu.CompilerParams(vmem_limit_bytes=vmem_limit),
    )(step_size, x_flat, a_bf16, w1_bd, w2_bd, cond_bd)


# ----------------------------------------------------------------------------
# ProximalGradientDescent in JAX (deterministic synthetic parameters)
# ----------------------------------------------------------------------------
class ProximalGradientDescentPallas:
    """JAX/Pallas counterpart of ProximalGradientDescent
    (use_complex_layers=False, share_weights=False, learn_sigma=False)."""

    def __init__(self, *, num_unrolls=3, num_emaps=2, num_features=32,
                 cond_dim=8, key=jax.random.PRNGKey(0)):
        self.num_unrolls = num_unrolls
        self.num_emaps = num_emaps
        self.num_features = num_features
        self.cond_dim = cond_dim
        C = 2 * num_emaps                      # real/imag stacked as channels
        F = num_features
        U = num_unrolls
        # PyTorch: self.step_size = nn.Parameter(torch.tensor([-2.0]))
        self.step_size = jnp.array([-2.0], dtype=jnp.float32)
        # Per-unroll synthetic LatteNet-stub parameters (stacked along U).
        k1, k2, k3, k4 = jax.random.split(key, 4)
        self.w1t = 0.1 * jax.random.normal(k1, (U, F, C), jnp.float32)   # = w1^T
        self.w2t = 0.1 * jax.random.normal(k2, (U, C, F), jnp.float32)   # = w2^T
        self.w_t = 0.1 * jax.random.normal(k3, (U, F), jnp.float32)
        self.w_c = 0.1 * jax.random.normal(k4, (U, cond_dim, F), jnp.float32)

    def __call__(self, x0, t, a_mat, c):
        """Mirrors forward(self, x0, t, A, c): ATy = x0; xi = x0; unrolled PGD."""
        B, C, H, W = x0.shape
        N = H * W
        F = self.num_features
        U = self.num_unrolls
        # Conditioning glue (tiny, computed once for all unrolls):
        #   cond[u, b, f] = t[b] * w_t[u, f] + (c @ w_c[u])[b, f]
        cond_ubf = (t[None, :, None] * self.w_t[:, None, :]
                    + jnp.einsum('bd,udf->ubf', c, self.w_c))
        cond_bd = cond_ubf.reshape(U, B * F, 1)              # rows ordered (b, f)
        # Block-diagonal (over batch) channel-mix weights so the regularizer is
        # exactly two MXU matmuls per unroll inside the kernel.
        eye_b = jnp.eye(B, dtype=jnp.float32)
        w1_bd = jnp.einsum('ij,ufc->uifjc', eye_b, self.w1t).reshape(U, B * F, B * C)
        w2_bd = jnp.einsum('ij,ucf->uicjf', eye_b, self.w2t).reshape(U, B * C, B * F)
        # A cast to bf16 once in the wrapper (half DMA bytes / VMEM footprint).
        a_bf16 = a_mat.astype(jnp.bfloat16)
        x_flat = x0.reshape(B * C, N)        # rows = b*C + c, pixels on lanes
        out = pgd_forward(self.step_size, x_flat, a_bf16, w1_bd, w2_bd, cond_bd)
        return out.reshape(B, C, H, W)


if __name__ == "__main__":
    key = jax.random.PRNGKey(0)
    k_x, k_a, k_t, k_c, k_p = jax.random.split(key, 5)

    B, num_emaps, H, W = 2, 2, 16, 16
    C = 2 * num_emaps                 # 4 channels (real/imag of 2 emaps)
    N = H * W                         # 256 pixels
    M = 128                           # measurements per (batch, channel) plane
    cond_dim = 8

    x0 = jax.random.normal(k_x, (B, C, H, W), jnp.float32)
    a_mat = jax.random.normal(k_a, (M, N), jnp.float32) / jnp.sqrt(float(N))
    t = jax.random.uniform(k_t, (B,), jnp.float32)
    c = jax.random.normal(k_c, (B, cond_dim), jnp.float32)

    model = ProximalGradientDescentPallas(num_unrolls=3, num_emaps=num_emaps,
                                          num_features=32, cond_dim=cond_dim, key=k_p)
    fwd = jax.jit(model.__call__)
    out = jax.block_until_ready(fwd(x0, t, a_mat, c))
    assert out.shape == (B, C, H, W) and out.dtype == jnp.float32
    assert bool(jnp.all(jnp.isfinite(out)))
    print("KERNEL_OK")
</pallas_src>

<mosaic_0001>
module attributes {stable_mosaic.version = 11 : i64} {
  func.func @_pgd_fused_kernel(%arg0: memref<1xf32, #tpu.memory_space<smem>>, %arg1: memref<8x256xf32, #tpu.memory_space<vmem>>, %arg2: memref<128x256xbf16, #tpu.memory_space<vmem>>, %arg3: memref<3x64x8xf32, #tpu.memory_space<vmem>>, %arg4: memref<3x8x64xf32, #tpu.memory_space<vmem>>, %arg5: memref<3x64x1xf32, #tpu.memory_space<vmem>>, %arg6: memref<8x256xf32, #tpu.memory_space<vmem>>) attributes {dimension_semantics = [], scalar_prefetch = 0 : i64, scratch_operands = 0 : i64, tpu.core_type = #tpu.core_type<tc>} {
    %c0 = arith.constant 0 : index
    %0 = memref.load %arg0[%c0] : memref<1xf32, #tpu.memory_space<smem>>
    %c0_0 = arith.constant 0 : index
    %c0_1 = arith.constant 0 : index
    %1 = vector.load %arg2[%c0_0, %c0_1] : memref<128x256xbf16, #tpu.memory_space<vmem>>, vector<128x256xbf16>
    %c0_2 = arith.constant 0 : index
    %c0_3 = arith.constant 0 : index
    %2 = vector.load %arg1[%c0_2, %c0_3] : memref<8x256xf32, #tpu.memory_space<vmem>>, vector<8x256xf32>
    %3 = arith.truncf %2 : vector<8x256xf32> to vector<8x256xbf16>
    %cst = arith.constant dense<0.000000e+00> : vector<8x128xf32>
    %4 = tpu.matmul %3, %1, %cst {dimension_numbers = #tpu.dot_dimension_numbers<[1], [1], [0], [0], [0, 0, 1, 0], [], []>} : vector<8x256xbf16>, vector<128x256xbf16>, vector<8x128xf32> -> vector<8x128xf32>
    %5 = arith.truncf %4 : vector<8x128xf32> to vector<8x128xbf16>
    %cst_4 = arith.constant dense<0.000000e+00> : vector<8x256xf32>
    %6 = tpu.matmul %5, %1, %cst_4 {dimension_numbers = #tpu.dot_dimension_numbers<[1], [0], [0], [1], [0, 0, 1, 1], [], []>} : vector<8x128xbf16>, vector<128x256xbf16>, vector<8x256xf32> -> vector<8x256xf32>
    %7 = arith.subf %6, %2 : vector<8x256xf32>
    %8 = vector.broadcast %0 : f32 to vector<8x256xf32>
    %9 = arith.mulf %8, %7 : vector<8x256xf32>
    %10 = arith.addf %2, %9 : vector<8x256xf32>
    %c0_5 = arith.constant 0 : index
    %c0_6 = arith.constant 0 : index
    %c0_7 = arith.constant 0 : index
    %11 = vector.load %arg3[%c0_5, %c0_6, %c0_7] : memref<3x64x8xf32, #tpu.memory_space<vmem>>, vector<1x64x8xf32>
    %12 = vector.shape_cast %11 : vector<1x64x8xf32> to vector<64x8xf32>
    %13 = arith.truncf %12 : vector<64x8xf32> to vector<64x8xbf16>
    %14 = arith.truncf %10 : vector<8x256xf32> to vector<8x256xbf16>
    %cst_8 = arith.constant dense<0.000000e+00> : vector<64x256xf32>
    %15 = tpu.matmul %13, %14, %cst_8 {dimension_numbers = #tpu.dot_dimension_numbers<[1], [0], [0], [1], [0, 0, 1, 1], [], []>} : vector<64x8xbf16>, vector<8x256xbf16>, vector<64x256xf32> -> vector<64x256xf32>
    %c0_9 = arith.constant 0 : index
    %c0_10 = arith.constant 0 : index
    %c0_11 = arith.constant 0 : index
    %16 = vector.load %arg5[%c0_9, %c0_10, %c0_11] : memref<3x64x1xf32, #tpu.memory_space<vmem>>, vector<1x64x1xf32>
    %17 = vector.shape_cast %16 : vector<1x64x1xf32> to vector<64x1xf32>
    %18 = vector.broadcast %17 : vector<64x1xf32> to vector<64x256xf32>
    %19 = arith.addf %15, %18 : vector<64x256xf32>
    %20 = arith.mulf %19, %19 : vector<64x256xf32>
    %21 = arith.mulf %19, %20 : vector<64x256xf32>
    %cst_12 = arith.constant 4.471500e-02 : f32
    %22 = vector.broadcast %cst_12 : f32 to vector<64x256xf32>
    %23 = arith.mulf %22, %21 : vector<64x256xf32>
    %24 = arith.addf %19, %23 : vector<64x256xf32>
    %cst_13 = arith.constant 0.797884583 : f32
    %25 = vector.broadcast %cst_13 : f32 to vector<64x256xf32>
    %26 = arith.mulf %25, %24 : vector<64x256xf32>
    %27 = math.tanh %26 : vector<64x256xf32>
    %cst_14 = arith.constant 1.000000e+00 : f32
    %28 = vector.broadcast %cst_14 : f32 to vector<64x256xf32>
    %29 = arith.addf %28, %27 : vector<64x256xf32>
    %cst_15 = arith.constant 5.000000e-01 : f32
    %30 = vector.broadcast %cst_15 : f32 to vector<64x256xf32>
    %31 = arith.mulf %30, %29 : vector<64x256xf32>
    %32 = arith.mulf %19, %31 : vector<64x256xf32>
    %c0_16 = arith.constant 0 : index
    %c0_17 = arith.constant 0 : index
    %c0_18 = arith.constant 0 : index
    %33 = vector.load %arg4[%c0_16, %c0_17, %c0_18] : memref<3x8x64xf32, #tpu.memory_space<vmem>>, vector<1x8x64xf32>
    %34 = vector.shape_cast %33 : vector<1x8x64xf32> to vector<8x64xf32>
    %35 = arith.truncf %34 : vector<8x64xf32> to vector<8x64xbf16>
    %36 = arith.truncf %32 : vector<64x256xf32> to vector<64x256xbf16>
    %cst_19 = arith.constant dense<0.000000e+00> : vector<8x256xf32>
    %37 = tpu.matmul %35, %36, %cst_19 {dimension_numbers = #tpu.dot_dimension_numbers<[1], [0], [0], [1], [0, 0, 1, 1], [], []>} : vector<8x64xbf16>, vector<64x256xbf16>, vector<8x256xf32> -> vector<8x256xf32>
    %38 = arith.addf %10, %37 : vector<8x256xf32>
    %39 = arith.truncf %38 : vector<8x256xf32> to vector<8x256xbf16>
    %cst_20 = arith.constant dense<0.000000e+00> : vector<8x128xf32>
    %40 = tpu.matmul %39, %1, %cst_20 {dimension_numbers = #tpu.dot_dimension_numbers<[1], [1], [0], [0], [0, 0, 1, 0], [], []>} : vector<8x256xbf16>, vector<128x256xbf16>, vector<8x128xf32> -> vector<8x128xf32>
    %41 = arith.truncf %40 : vector<8x128xf32> to vector<8x128xbf16>
    %cst_21 = arith.constant dense<0.000000e+00> : vector<8x256xf32>
    %42 = tpu.matmul %41, %1, %cst_21 {dimension_numbers = #tpu.dot_dimension_numbers<[1], [0], [0], [1], [0, 0, 1, 1], [], []>} : vector<8x128xbf16>, vector<128x256xbf16>, vector<8x256xf32> -> vector<8x256xf32>
    %43 = arith.subf %42, %2 : vector<8x256xf32>
    %44 = vector.broadcast %0 : f32 to vector<8x256xf32>
    %45 = arith.mulf %44, %43 : vector<8x256xf32>
    %46 = arith.addf %38, %45 : vector<8x256xf32>
    %c1 = arith.constant 1 : index
    %c0_22 = arith.constant 0 : index
    %c0_23 = arith.constant 0 : index
    %47 = vector.load %arg3[%c1, %c0_22, %c0_23] : memref<3x64x8xf32, #tpu.memory_space<vmem>>, vector<1x64x8xf32>
    %48 = vector.shape_cast %47 : vector<1x64x8xf32> to vector<64x8xf32>
    %49 = arith.truncf %48 : vector<64x8xf32> to vector<64x8xbf16>
    %50 = arith.truncf %46 : vector<8x256xf32> to vector<8x256xbf16>
    %cst_24 = arith.constant dense<0.000000e+00> : vector<64x256xf32>
    %51 = tpu.matmul %49, %50, %cst_24 {dimension_numbers = #tpu.dot_dimension_numbers<[1], [0], [0], [1], [0, 0, 1, 1], [], []>} : vector<64x8xbf16>, vector<8x256xbf16>, vector<64x256xf32> -> vector<64x256xf32>
    %c1_25 = arith.constant 1 : index
    %c0_26 = arith.constant 0 : index
    %c0_27 = arith.constant 0 : index
    %52 = vector.load %arg5[%c1_25, %c0_26, %c0_27] : memref<3x64x1xf32, #tpu.memory_space<vmem>>, vector<1x64x1xf32>
    %53 = vector.shape_cast %52 : vector<1x64x1xf32> to vector<64x1xf32>
    %54 = vector.broadcast %53 : vector<64x1xf32> to vector<64x256xf32>
    %55 = arith.addf %51, %54 : vector<64x256xf32>
    %56 = arith.mulf %55, %55 : vector<64x256xf32>
    %57 = arith.mulf %55, %56 : vector<64x256xf32>
    %cst_28 = arith.constant 4.471500e-02 : f32
    %58 = vector.broadcast %cst_28 : f32 to vector<64x256xf32>
    %59 = arith.mulf %58, %57 : vector<64x256xf32>
    %60 = arith.addf %55, %59 : vector<64x256xf32>
    %cst_29 = arith.constant 0.797884583 : f32
    %61 = vector.broadcast %cst_29 : f32 to vector<64x256xf32>
    %62 = arith.mulf %61, %60 : vector<64x256xf32>
    %63 = math.tanh %62 : vector<64x256xf32>
    %cst_30 = arith.constant 1.000000e+00 : f32
    %64 = vector.broadcast %cst_30 : f32 to vector<64x256xf32>
    %65 = arith.addf %64, %63 : vector<64x256xf32>
    %cst_31 = arith.constant 5.000000e-01 : f32
    %66 = vector.broadcast %cst_31 : f32 to vector<64x256xf32>
    %67 = arith.mulf %66, %65 : vector<64x256xf32>
    %68 = arith.mulf %55, %67 : vector<64x256xf32>
    %c1_32 = arith.constant 1 : index
    %c0_33 = arith.constant 0 : index
    %c0_34 = arith.constant 0 : index
    %69 = vector.load %arg4[%c1_32, %c0_33, %c0_34] : memref<3x8x64xf32, #tpu.memory_space<vmem>>, vector<1x8x64xf32>
    %70 = vector.shape_cast %69 : vector<1x8x64xf32> to vector<8x64xf32>
    %71 = arith.truncf %70 : vector<8x64xf32> to vector<8x64xbf16>
    %72 = arith.truncf %68 : vector<64x256xf32> to vector<64x256xbf16>
    %cst_35 = arith.constant dense<0.000000e+00> : vector<8x256xf32>
    %73 = tpu.matmul %71, %72, %cst_35 {dimension_numbers = #tpu.dot_dimension_numbers<[1], [0], [0], [1], [0, 0, 1, 1], [], []>} : vector<8x64xbf16>, vector<64x256xbf16>, vector<8x256xf32> -> vector<8x256xf32>
    %74 = arith.addf %46, %73 : vector<8x256xf32>
    %75 = arith.truncf %74 : vector<8x256xf32> to vector<8x256xbf16>
    %cst_36 = arith.constant dense<0.000000e+00> : vector<8x128xf32>
    %76 = tpu.matmul %75, %1, %cst_36 {dimension_numbers = #tpu.dot_dimension_numbers<[1], [1], [0], [0], [0, 0, 1, 0], [], []>} : vector<8x256xbf16>, vector<128x256xbf16>, vector<8x128xf32> -> vector<8x128xf32>
    %77 = arith.truncf %76 : vector<8x128xf32> to vector<8x128xbf16>
    %cst_37 = arith.constant dense<0.000000e+00> : vector<8x256xf32>
    %78 = tpu.matmul %77, %1, %cst_37 {dimension_numbers = #tpu.dot_dimension_numbers<[1], [0], [0], [1], [0, 0, 1, 1], [], []>} : vector<8x128xbf16>, vector<128x256xbf16>, vector<8x256xf32> -> vector<8x256xf32>
    %79 = arith.subf %78, %2 : vector<8x256xf32>
    %80 = vector.broadcast %0 : f32 to vector<8x256xf32>
    %81 = arith.mulf %80, %79 : vector<8x256xf32>
    %82 = arith.addf %74, %81 : vector<8x256xf32>
    %c2 = arith.constant 2 : index
    %c0_38 = arith.constant 0 : index
    %c0_39 = arith.constant 0 : index
    %83 = vector.load %arg3[%c2, %c0_38, %c0_39] : memref<3x64x8xf32, #tpu.memory_space<vmem>>, vector<1x64x8xf32>
    %84 = vector.shape_cast %83 : vector<1x64x8xf32> to vector<64x8xf32>
    %85 = arith.truncf %84 : vector<64x8xf32> to vector<64x8xbf16>
    %86 = arith.truncf %82 : vector<8x256xf32> to vector<8x256xbf16>
    %cst_40 = arith.constant dense<0.000000e+00> : vector<64x256xf32>
    %87 = tpu.matmul %85, %86, %cst_40 {dimension_numbers = #tpu.dot_dimension_numbers<[1], [0], [0], [1], [0, 0, 1, 1], [], []>} : vector<64x8xbf16>, vector<8x256xbf16>, vector<64x256xf32> -> vector<64x256xf32>
    %c2_41 = arith.constant 2 : index
    %c0_42 = arith.constant 0 : index
    %c0_43 = arith.constant 0 : index
    %88 = vector.load %arg5[%c2_41, %c0_42, %c0_43] : memref<3x64x1xf32, #tpu.memory_space<vmem>>, vector<1x64x1xf32>
    %89 = vector.shape_cast %88 : vector<1x64x1xf32> to vector<64x1xf32>
    %90 = vector.broadcast %89 : vector<64x1xf32> to vector<64x256xf32>
    %91 = arith.addf %87, %90 : vector<64x256xf32>
    %92 = arith.mulf %91, %91 : vector<64x256xf32>
    %93 = arith.mulf %91, %92 : vector<64x256xf32>
    %cst_44 = arith.constant 4.471500e-02 : f32
    %94 = vector.broadcast %cst_44 : f32 to vector<64x256xf32>
    %95 = arith.mulf %94, %93 : vector<64x256xf32>
    %96 = arith.addf %91, %95 : vector<64x256xf32>
    %cst_45 = arith.constant 0.797884583 : f32
    %97 = vector.broadcast %cst_45 : f32 to vector<64x256xf32>
    %98 = arith.mulf %97, %96 : vector<64x256xf32>
    %99 = math.tanh %98 : vector<64x256xf32>
    %cst_46 = arith.constant 1.000000e+00 : f32
    %100 = vector.broadcast %cst_46 : f32 to vector<64x256xf32>
    %101 = arith.addf %100, %99 : vector<64x256xf32>
    %cst_47 = arith.constant 5.000000e-01 : f32
    %102 = vector.broadcast %cst_47 : f32 to vector<64x256xf32>
    %103 = arith.mulf %102, %101 : vector<64x256xf32>
    %104 = arith.mulf %91, %103 : vector<64x256xf32>
    %c2_48 = arith.constant 2 : index
    %c0_49 = arith.constant 0 : index
    %c0_50 = arith.constant 0 : index
    %105 = vector.load %arg4[%c2_48, %c0_49, %c0_50] : memref<3x8x64xf32, #tpu.memory_space<vmem>>, vector<1x8x64xf32>
    %106 = vector.shape_cast %105 : vector<1x8x64xf32> to vector<8x64xf32>
    %107 = arith.truncf %106 : vector<8x64xf32> to vector<8x64xbf16>
    %108 = arith.truncf %104 : vector<64x256xf32> to vector<64x256xbf16>
    %cst_51 = arith.constant dense<0.000000e+00> : vector<8x256xf32>
    %109 = tpu.matmul %107, %108, %cst_51 {dimension_numbers = #tpu.dot_dimension_numbers<[1], [0], [0], [1], [0, 0, 1, 1], [], []>} : vector<8x64xbf16>, vector<64x256xbf16>, vector<8x256xf32> -> vector<8x256xf32>
    %110 = arith.addf %82, %109 : vector<8x256xf32>
    %c0_52 = arith.constant 0 : index
    %c0_53 = arith.constant 0 : index
    %111 = vector.load %arg6[%c0_52, %c0_53] : memref<8x256xf32, #tpu.memory_space<vmem>>, vector<8x256xf32>
    tpu.vector_store %arg6[%c0_52, %c0_53], %110 {strides = array<i32>} : memref<8x256xf32, #tpu.memory_space<vmem>>, vector<8x256xf32>,
    return
  }
}

</mosaic_0001>

<bundles_post_ra>
// kernel: a_call__.1
= control target key start
LH: loop header
LB: loop body
LE: loop exit
PB: predicated region body
PF: predicated region fallthrough
CT: control target
= control target key end

     0   :  { %v1538_v58 = vmov 0   ;;  %vm261_vm0 = vcmask 1043456   ;;  %vm248_vm1 = vcmask 64512   ;;  %vm480_vm2 = vcmask 523264   ;;  %s2408_s2 = inlined_call_operand.vmem [shape: bf16[128,256], index: 2, kind: input, shape index: {}]   ;;  %s2409_s1 = inlined_call_operand.vmem [shape: f32[8,256], index: 1, kind: input, shape index: {}, may-alias: {1,6}]   ;;  %s2410_s5 = inlined_call_operand.vmem [shape: f32[3,64,1], index: 5, kind: input, shape index: {}]   ;;  %s2411_s0 = inlined_call_operand.<no memory space> [shape: f32[1], index: 0, kind: input, shape index: {}]   ;;  %s2412_s3 = inlined_call_operand.vmem [shape: f32[3,64,8], index: 3, kind: input, shape index: {}]   ;;  %s2413_s4 = inlined_call_operand.vmem [shape: f32[3,8,64], index: 4, kind: input, shape index: {}]   ;;  %s2414_s6 = inlined_call_operand.vmem [shape: f32[8,256], index: 6, kind: output, shape index: {}, may-alias: {1,6}]  }
   0x1   :  { %v1350_v0 = vld [vmem:[%s2408_s2 + $0x70] sm:$0xf]  ;;  %v1435_v1 = vld [vmem:[%s2408_s2 + $0x74] sm:$0xf0]  ;;  %v1434_v2 = vld [vmem:[%s2408_s2 + $0x74] sm:$0xf]  ;;  %1437 = vset.pattern.permute.xlu0 %v1538_v58  ;;  %1438 = vset.pattern.permute.xlu1 %v1538_v58 }
   0x2   :  { %v1583_v3 = vor.u32 %v1435_v1, %v1350_v0  ;;  %v1352_v4 = vld [vmem:[%s2408_s2 + $0x78] sm:$0xf0]  ;;  %v1342_v6 = vld [vmem:[%s2408_s2 + $0x60] sm:$0xf]  ;;  %v1433_v7 = vld [vmem:[%s2408_s2 + $0x64] sm:$0xf0]  ;;  %1439 = vset.pattern.permute.xlu2 %v1538_v58  ;;  %v1766_v1 = vstv %s2411_s0 }
   0x3   :  { %v1588_v5 = vor.u32 %v1434_v2, %v1352_v4  ;;  %v1432_v8 = vld [vmem:[%s2408_s2 + $0x64] sm:$0xf]  ;;  %v1344_v9 = vld [vmem:[%s2408_s2 + $0x68] sm:$0xf0]  ;;  %v1606_v10 = vor.u32 %v1433_v7, %v1342_v6  ;;  %v1334_v12 = vld [vmem:[%s2408_s2 + $0x50] sm:$0xf] }
   0x4   :  { %126 = vmatpush.bf16.xpose.msra.mxu0 %v1583_v3  ;;  %153 = vmatpush.bf16.msra.mxu2 %v1583_v3  ;;  %v1608_v11 = vor.u32 %v1432_v8, %v1344_v9  ;;  %v1431_v13 = vld [vmem:[%s2408_s2 + $0x54] sm:$0xf0]  ;;  %v1430_v14 = vld [vmem:[%s2408_s2 + $0x54] sm:$0xf]  ;;  %v1336_v15 = vld [vmem:[%s2408_s2 + $0x58] sm:$0xf0] }
   0x5   :  { %139 = vmatpush.bf16.xpose.msra.mxu1 %v1588_v5  ;;  %166 = vmatpush.bf16.msra.mxu3 %v1588_v5  ;;  %v1624_v16 = vor.u32 %v1431_v13, %v1334_v12  ;;  %v1626_v17 = vor.u32 %v1430_v14, %v1336_v15  ;;  %v1326_v18 = vld [vmem:[%s2408_s2 + $0x40] sm:$0xf]  ;;  %v1429_v19 = vld [vmem:[%s2408_s2 + $0x44] sm:$0xf0]  ;;  %v1428_v20 = vld [vmem:[%s2408_s2 + $0x44] sm:$0xf] }
   0x6   :  { %v1328_v21 = vld [vmem:[%s2408_s2 + $0x48] sm:$0xf0]  ;;  %v1644_v22 = vor.u32 %v1429_v19, %v1326_v18  ;;  %v1318_v24 = vld [vmem:[%s2408_s2 + $0x30] sm:$0xf]  ;;  %v1427_v25 = vld [vmem:[%s2408_s2 + $0x34] sm:$0xf0] }
   0x7   :  { %v1646_v23 = vor.u32 %v1428_v20, %v1328_v21  ;;  %v1426_v26 = vld [vmem:[%s2408_s2 + $0x34] sm:$0xf]  ;;  %v1320_v27 = vld [vmem:[%s2408_s2 + $0x38] sm:$0xf0]  ;;  %v1662_v28 = vor.u32 %v1427_v25, %v1318_v24  ;;  %v1310_v30 = vld [vmem:[%s2408_s2 + $0x20] sm:$0xf] }
   0x8   :  { %154 = vmatpush.bf16.msra.mxu2 %v1606_v10  ;;  %v1664_v29 = vor.u32 %v1426_v26, %v1320_v27  ;;  %v1425_v31 = vld [vmem:[%s2408_s2 + $0x24] sm:$0xf0]  ;;  %v1424_v32 = vld [vmem:[%s2408_s2 + $0x24] sm:$0xf]  ;;  %v1312_v33 = vld [vmem:[%s2408_s2 + $0x28] sm:$0xf0] }
   0x9   :  { %167 = vmatpush.bf16.msra.mxu3 %v1608_v11  ;;  %v1682_v34 = vor.u32 %v1425_v31, %v1310_v30  ;;  %v1684_v35 = vor.u32 %v1424_v32, %v1312_v33  ;;  %v1302_v36 = vld [vmem:[%s2408_s2 + $0x10] sm:$0xf]  ;;  %v1423_v37 = vld [vmem:[%s2408_s2 + $0x14] sm:$0xf0]  ;;  %v1422_v38 = vld [vmem:[%s2408_s2 + $0x14] sm:$0xf] }
   0xa   :  { %v1304_v39 = vld [vmem:[%s2408_s2 + $0x18] sm:$0xf0]  ;;  %v1700_v40 = vor.u32 %v1423_v37, %v1302_v36  ;;  %v1294_v42 = vld [vmem:[%s2408_s2] sm:$0xf]  ;;  %v1421_v43 = vld [vmem:[%s2408_s2 + $0x4] sm:$0xf0] }
   0xb   :  { %v1702_v41 = vor.u32 %v1422_v38, %v1304_v39  ;;  %v1420_v44 = vld [vmem:[%s2408_s2 + $0x4] sm:$0xf]  ;;  %v1296_v45 = vld [vmem:[%s2408_s2 + $0x8] sm:$0xf0]  ;;  %v1720_v46 = vor.u32 %v1421_v43, %v1294_v42  ;;  %v206_v59 = vld [vmem:[%s2410_s5 + $0x30] sm:$0xff]  ;;  %2419 = vst [vmem:[#allocation4_spill] sm:$0xff] %v1766_v1 }
   0xc   :  { %127 = vmatpush.bf16.xpose.msra.mxu0 %v1606_v10  ;;  %155 = vmatpush.bf16.msra.mxu2 %v1624_v16  ;;  %v1722_v47 = vor.u32 %v1420_v44, %v1296_v45  ;;  %v1736_v48 = vld [vmem:[%s2409_s1] sm:$0xff]  ;;  %v1742_v49 = vld [vmem:[%s2409_s1 + $0x8] sm:$0xff]  ;;  %v207_v61 = vld [vmem:[%s2410_s5 + $0x38] sm:$0xff] }
   0xd   :  { %140 = vmatpush.bf16.xpose.msra.mxu1 %v1608_v11  ;;  %168 = vmatpush.bf16.msra.mxu3 %v1626_v17  ;;  %2418 = vst [vmem:[#allocation3_spill] sm:$0xff] %v1742_v49  ;;  %v44_v50 = vpack.c.bf16 %v1736_v48, %v1736_v48  ;;  %v45_v51 = vpack.c.bf16 %v1742_v49, %v1742_v49  ;;  %v204_v60 = vld [vmem:[%s2410_s5 + $0x20] sm:$0xff]  ;;  %v205_v62 = vld [vmem:[%s2410_s5 + $0x28] sm:$0xff]  ;;  %v1381_v27 = vld [vmem:[%s2410_s5 + $0x78] sm:$0xff] }
   0xe   :  { %240 = vperm.xlu0 %1437, %v206_v59   ;;  %230 = vperm.xlu1 %1438, %v204_v60   ;;  %v200_v63 = vld [vmem:[%s2410_s5] sm:$0xff]  ;;  %v201_v9 = vld [vmem:[%s2410_s5 + $0x8] sm:$0xff]  ;;  %v202_v31 = vld [vmem:[%s2410_s5 + $0x10] sm:$0xff] }
   0xf   :  { %v186_v14 = vld [vmem:[%s2412_s3] sm:$0xff]  ;;  %v187_v15 = vld [vmem:[%s2412_s3 + $0x8] sm:$0xff]  ;;  %220 = vperm.xlu2 %1439, %v202_v31   ;;  %v1376_v32 = vld [vmem:[%s2410_s5 + $0x50] sm:$0xff] }
  0x10   :  { %156 = vmatpush.bf16.msra.mxu2 %v1644_v22  ;;  %v194_v26 = vpack.c.bf16 %v187_v15, %v186_v14  ;;  %v1378_v30 = vld [vmem:[%s2410_s5 + $0x60] sm:$0xff]  ;;  %v1377_v33 = vld [vmem:[%s2410_s5 + $0x58] sm:$0xff]  ;;  %v188_v36 = vld [vmem:[%s2412_s3 + $0x10] sm:$0xff] }
  0x11   :  { %169 = vmatpush.bf16.msra.mxu3 %v1646_v23  ;;  %v189_v37 = vld [vmem:[%s2412_s3 + $0x18] sm:$0xff]  ;;  %v1375_v42 = vld [vmem:[%s2410_s5 + $0x48] sm:$0xff]  ;;  %v1407_v43 = vld [vmem:[%s2410_s5 + $0xb0] sm:$0xff] }
  0x12   :  { %v195_v38 = vpack.c.bf16 %v189_v37, %v188_v36  ;;  %v203_v39 = vld [vmem:[%s2410_s5 + $0x18] sm:$0xff]  ;;  %v1380_v44 = vld [vmem:[%s2410_s5 + $0x70] sm:$0xff]  ;;  %v1405_v45 = vld [vmem:[%s2410_s5 + $0xa0] sm:$0xff] }
  0x13   :  { %v192_v58 = vld [vmem:[%s2412_s3 + $0x30] sm:$0xff]  ;;  %v193_v59 = vld [vmem:[%s2412_s3 + $0x38] sm:$0xff] }
  0x14   :  { %128 = vmatpush.bf16.xpose.msra.mxu0 %v1624_v16  ;;  %157 = vmatpush.bf16.msra.mxu2 %v1662_v28  ;;  %v197_v60 = vpack.c.bf16 %v193_v59, %v192_v58 }
  0x15   :  { %141 = vmatpush.bf16.xpose.msra.mxu1 %v1626_v17  ;;  %170 = vmatpush.bf16.msra.mxu3 %v1664_v29 }
  0x16   :  { %245 = vperm.xlu0 %1437, %v207_v61   ;;  %235 = vperm.xlu1 %1438, %v205_v62   ;;  %v1408_v61 = vld [vmem:[%s2410_s5 + $0xb8] sm:$0xff]  ;;  %v1403_v62 = vld [vmem:[%s2410_s5 + $0x90] sm:$0xff] }
  0x17   :  { %225 = vperm.xlu2 %1439, %v203_v39  }
  0x18   :  { %158 = vmatpush.bf16.msra.mxu2 %v1682_v34 }
  0x19   :  { %171 = vmatpush.bf16.msra.mxu3 %v1684_v35 }
  0x1c   :  { %129 = vmatpush.bf16.xpose.msra.mxu0 %v1644_v22  ;;  %159 = vmatpush.bf16.msra.mxu2 %v1700_v40 }
  0x1d   :  { %142 = vmatpush.bf16.xpose.msra.mxu1 %v1646_v23  ;;  %172 = vmatpush.bf16.msra.mxu3 %v1702_v41 }
  0x1e   :  { %210 = vperm.xlu0 %1437, %v200_v63   ;;  %215 = vperm.xlu1 %1438, %v201_v9   ;;  %v1402_v63 = vld [vmem:[%s2410_s5 + $0x88] sm:$0xff] }
  0x1f   :  { %629 = vperm.xlu2 %1439, %v1380_v44  }
  0x20   :  { %160 = vmatpush.bf16.msra.mxu2 %v1720_v46 }
  0x21   :  { %173 = vmatpush.bf16.msra.mxu3 %v1722_v47 }
  0x24   :  { %130 = vmatpush.bf16.xpose.msra.mxu0 %v1662_v28 }
  0x25   :  { %143 = vmatpush.bf16.xpose.msra.mxu1 %v1664_v29 }
  0x26   :  { %634 = vperm.xlu0 %1437, %v1381_v27   ;;  %619 = vperm.xlu1 %1438, %v1378_v30  }
  0x2c   :  { %131 = vmatpush.bf16.xpose.msra.mxu0 %v1682_v34 }
  0x2d   :  { %144 = vmatpush.bf16.xpose.msra.mxu1 %v1684_v35 }
  0x2e   :  { %609 = vperm.xlu0 %1437, %v1376_v32   ;;  %614 = vperm.xlu1 %1438, %v1377_v33  }
  0x34   :  { %132 = vmatpush.bf16.xpose.msra.mxu0 %v1700_v40 }
  0x35   :  { %145 = vmatpush.bf16.xpose.msra.mxu1 %v1702_v41 }
  0x36   :  { %604 = vperm.xlu0 %1437, %v1375_v42   ;;  %1016 = vperm.xlu1 %1438, %v1407_v43  }
  0x3c   :  { %133 = vmatpush.bf16.xpose.msra.mxu0 %v1720_v46 }
  0x3d   :  { %146 = vmatpush.bf16.xpose.msra.mxu1 %v1722_v47 }
  0x3e   :  { %1006 = vperm.xlu0 %1437, %v1405_v45  }
  0x43   :  { %134 = vmatmul.bf16.vlgmr.msra.gmra.mxu0 %v44_v50  ;;  %v1406_v50 = vld [vmem:[%s2410_s5 + $0xa8] sm:$0xff] }
  0x44   :  { %147 = vmatmul.bf16.vlgmr.msra.gmra.mxu1 %v45_v51  ;;  %v190_v51 = vld [vmem:[%s2412_s3 + $0x20] sm:$0xff]  ;;  %1011 = vperm.xlu1 %1438, %v1406_v50  }
  0x80   :  { %v241_v9 = vpop.permute.xlu0 %240  ;;  %v231_v14 = vpop.permute.xlu1 %230 }
  0xc0   :  { %v135_v52 = vpop.f32.mrf.mxu0 }
  0xc1   :  { %v148_v53 = vpop.f32.mrf.mxu1 }
  0xc2   :  { %v149_v54 = vadd.f32 %v148_v53, %v135_v52  ;;  %v191_v52 = vld [vmem:[%s2412_s3 + $0x28] sm:$0xff] }
  0xc3   :  { %v196_v53 = vpack.c.bf16 %v191_v52, %v190_v51 }
  0xc4   :  { %v152_v55 = vpack.c.bf16 %v149_v54, %v149_v54  ;;  %v1379_v54 = vld [vmem:[%s2410_s5 + $0x68] sm:$0xff] }
  0xc5   :  { %624 = vperm.xlu2 %1439, %v1379_v54  }
  0xc6   :  { %161 = vmatmul.bf16.vlgmr.msra.gmra.mxu2 %v152_v55  ;;  %174 = vmatmul.bf16.vlgmr.msra.gmra.mxu3 %v152_v55  ;;  %v1404_v55 = vld [vmem:[%s2410_s5 + $0x98] sm:$0xff] }
  0xc7   :  { %1001 = vperm.xlu0 %1437, %v1404_v55  }
  0xc8   :  { %v137_v56 = vpop.f32.mrf.mxu0 }
  0xc9   :  { %v150_v57 = vpop.f32.mrf.mxu1  ;;  %v1401_v56 = vld [vmem:[%s2410_s5 + $0x80] sm:$0xff] }
  0xca   :  { %986 = vperm.xlu1 %1438, %v1401_v56   ;;  %v1374_v57 = vld [vmem:[%s2410_s5 + $0x40] sm:$0xff] }
  0xcd   :  { %599 = vperm.xlu2 %1439, %v1374_v57  }
  0xd5   :  { %1021 = vperm.xlu2 %1439, %v1408_v61  }
  0xdd   :  { %996 = vperm.xlu2 %1439, %v1403_v62  }
  0xe5   :  { %991 = vperm.xlu2 %1439, %v1402_v63  }
 0x149   :  { %v162_v0 = vpop.f32.mrf.mxu2  ;;  %v175_v2 = vpop.f32.mrf.mxu3 }
 0x14a   :  { %v179_v4 = vsub.f32 %v162_v0, %v1736_v48  ;;  %v180_v6 = vsub.f32 %v175_v2, %v1742_v49 }
 0x14c   :  { %v182_v7 = vmul.f32 %v1766_v1, %v179_v4  ;;  %v183_v8 = vmul.f32 %v1766_v1, %v180_v6 }
 0x14e   :  { %v1776_v12 = vadd.f32 %v182_v7, %v1736_v48  ;;  %v1779_v13 = vadd.f32 %v183_v8, %v1742_v49 }
 0x150   :  { %v198_v18 = vpack.c.bf16 %v1776_v12, %v1776_v12  ;;  %v199_v19 = vpack.c.bf16 %v1779_v13, %v1779_v13 }
 0x151   :  { %v164_v20 = vpop.f32.mrf.mxu2  ;;  %v177_v21 = vpop.f32.mrf.mxu3 }
 0x152   :  { %v263_v24 = vsel %vm261_vm0, %v198_v18, 0  ;;  %v266_v25 = vsel %vm261_vm0, %v199_v19, 0  ;;  %v221_v19 = vpop.permute.xlu2 %220  ;;  %v1889_v20 = vpop.permute.xlu0 %245 }
 0x153   :  { %275 = vmatpush.bf16.msrb.mxu2 %v263_v24  ;;  %304 = vmatpush.bf16.msrb.mxu3 %v266_v25  ;;  %v236_v25 = vpop.permute.xlu1 %235 }
 0x156   :  { %1356 = vmatmul.msk.bf16.vlgmr.msrb.gmra.mxu2 %vm248_vm1, %v194_v26  ;;  %1360 = vmatmul.msk.bf16.vlgmr.msrb.gmra.mxu3 %vm248_vm1, %v194_v26 }
 0x157   :  { %514 = vmatpush.bf16.xpose.msra.mxu2 %v1583_v3  ;;  %527 = vmatpush.bf16.xpose.msra.mxu3 %v1588_v5 }
 0x15a   :  { %v226_v26 = vpop.permute.xlu2 %225  ;;  %v211_v30 = vpop.permute.xlu0 %210 }
 0x15b   :  { %v216_v44 = vpop.permute.xlu1 %215 }
 0x15f   :  { %515 = vmatpush.bf16.xpose.msra.mxu2 %v1606_v10  ;;  %528 = vmatpush.bf16.xpose.msra.mxu3 %v1608_v11 }
 0x166   :  { %1357 = vmatmul.msk.bf16.gmra.mxu2 %vm248_vm1, %v195_v38  ;;  %1361 = vmatmul.msk.bf16.gmra.mxu3 %vm248_vm1, %v195_v38 }
 0x167   :  { %516 = vmatpush.bf16.xpose.msra.mxu2 %v1624_v16  ;;  %529 = vmatpush.bf16.xpose.msra.mxu3 %v1626_v17 }
 0x16f   :  { %517 = vmatpush.bf16.xpose.msra.mxu2 %v1644_v22  ;;  %530 = vmatpush.bf16.xpose.msra.mxu3 %v1646_v23 }
 0x176   :  { %1358 = vmatmul.msk.bf16.gmra.mxu2 %vm248_vm1, %v196_v53  ;;  %1362 = vmatmul.msk.bf16.gmra.mxu3 %vm248_vm1, %v196_v53 }
 0x177   :  { %518 = vmatpush.bf16.xpose.msra.mxu2 %v1662_v28  ;;  %531 = vmatpush.bf16.xpose.msra.mxu3 %v1664_v29 }
 0x17f   :  { %519 = vmatpush.bf16.xpose.msra.mxu2 %v1682_v34  ;;  %532 = vmatpush.bf16.xpose.msra.mxu3 %v1684_v35 }
 0x186   :  { %1359 = vmatmul.msk.bf16.gmra.mxu2 %vm248_vm1, %v197_v60  ;;  %1363 = vmatmul.msk.bf16.gmra.mxu3 %vm248_vm1, %v197_v60 }
 0x187   :  { %520 = vmatpush.bf16.xpose.msra.mxu2 %v1700_v40  ;;  %533 = vmatpush.bf16.xpose.msra.mxu3 %v1702_v41 }
 0x18f   :  { %521 = vmatpush.bf16.xpose.msra.mxu2 %v1720_v46  ;;  %534 = vmatpush.bf16.xpose.msra.mxu3 %v1722_v47 }
 0x1d9   :  { %v277_v0 = vpop.f32.mrf.mxu2  ;;  %v306_v2 = vpop.f32.mrf.mxu3 }
 0x1da   :  { %v1897_v37 = vadd.f32 %v277_v0, %v211_v30  ;;  %v1914_v53 = vadd.f32 %v306_v2, %v211_v30 }
 0x1dc   :  { %v326_v52 = vmul.f32 %v1897_v37, %v1897_v37 }
 0x1de   :  { %v342_v2 = vmul.f32 %v326_v52, %v1897_v37 }
 0x1e1   :  { %v279_v4 = vpop.f32.mrf.mxu2  ;;  %v308_v6 = vpop.f32.mrf.mxu3 }
 0x1e2   :  { %v1921_v57 = vadd.f32 %v279_v4, %v216_v44 }
 0x1e9   :  { %v282_v7 = vpop.f32.mrf.mxu2  ;;  %v311_v8 = vpop.f32.mrf.mxu3 }
 0x1ea   :  { %v1916_v54 = vadd.f32 %v282_v7, %v221_v19  ;;  %v1925_v59 = vadd.f32 %v311_v8, %v221_v19  ;;  %v327_v7 = vmul.f32 %v1914_v53, %v1914_v53 }
 0x1ec   :  { %v330_v8 = vmul.f32 %v1916_v54, %v1916_v54 }
 0x1f1   :  { %v284_v15 = vpop.f32.mrf.mxu2  ;;  %v313_v18 = vpop.f32.mrf.mxu3 }
 0x1f2   :  { %v1891_v27 = vadd.f32 %v284_v15, %v226_v26  ;;  %v1893_v31 = vadd.f32 %v313_v18, %v226_v26  ;;  %v1937_v15 = vadd.f32 %v308_v6, %v216_v44  ;;  %v331_v6 = vmul.f32 %v1925_v59, %v1925_v59 }
 0x1f4   :  { %v332_v32 = vmul.f32 %v1891_v27, %v1891_v27  ;;  %v333_v39 = vmul.f32 %v1893_v31, %v1893_v31 }
 0x1f6   :  { %v348_v45 = vmul.f32 %v332_v32, %v1891_v27  ;;  %v349_v55 = vmul.f32 %v333_v39, %v1893_v31 }
 0x1f8   :  { %v364_v60 = vmul.f32 0.044715, %v348_v45  ;;  %v365_v18 = vmul.f32 0.044715, %v349_v55  ;;  %v329_v45 = vmul.f32 %v1937_v15, %v1937_v15 }
 0x1f9   :  { %v287_v21 = vpop.f32.mrf.mxu2  ;;  %v316_v24 = vpop.f32.mrf.mxu3 }
 0x1fa   :  { %v1905_v43 = vadd.f32 %v287_v21, %v231_v14  ;;  %v1908_v50 = vadd.f32 %v316_v24, %v231_v14  ;;  %v328_v21 = vmul.f32 %v1921_v57, %v1921_v57  ;;  %v380_v26 = vadd.f32 %v364_v60, %v1891_v27 }
 0x1fb   :  { %v381_v52 = vadd.f32 %v365_v18, %v1893_v31 }
 0x1fc   :  { %v334_v58 = vmul.f32 %v1905_v43, %v1905_v43  ;;  %v335_v61 = vmul.f32 %v1908_v50, %v1908_v50 }
 0x1fe   :  { %v350_v24 = vmul.f32 %v334_v58, %v1905_v43  ;;  %v351_v30 = vmul.f32 %v335_v61, %v1908_v50 }
 0x200   :  { %v366_v58 = vmul.f32 0.044715, %v350_v24 }
 0x201   :  { %v289_v33 = vpop.f32.mrf.mxu2  ;;  %v318_v36 = vpop.f32.mrf.mxu3 }
 0x202   :  { %v1899_v38 = vadd.f32 %v289_v33, %v236_v25  ;;  %v1903_v42 = vadd.f32 %v318_v36, %v236_v25  ;;  %v358_v33 = vmul.f32 0.044715, %v342_v2  ;;  %v343_v36 = vmul.f32 %v327_v7, %v1914_v53 }
 0x204   :  { %v336_v51 = vmul.f32 %v1899_v38, %v1899_v38  ;;  %v337_v56 = vmul.f32 %v1903_v42, %v1903_v42 }
 0x206   :  { %v352_v62 = vmul.f32 %v336_v51, %v1899_v38  ;;  %v353_v19 = vmul.f32 %v337_v56, %v1903_v42  ;;  %v346_v51 = vmul.f32 %v330_v8, %v1916_v54  ;;  %v344_v56 = vmul.f32 %v328_v21, %v1921_v57 }
 0x207   :  { %v345_v21 = vmul.f32 %v329_v45, %v1937_v15 }
 0x208   :  { %v368_v32 = vmul.f32 0.044715, %v352_v62  ;;  %v369_v55 = vmul.f32 0.044715, %v353_v19  ;;  %v347_v62 = vmul.f32 %v331_v6, %v1925_v59  ;;  %v362_v24 = vmul.f32 0.044715, %v346_v51 }
 0x209   :  { %v292_v63 = vpop.f32.mrf.mxu2  ;;  %v321_v0 = vpop.f32.mrf.mxu3 }
 0x20a   :  { %v1933_v4 = vadd.f32 %v292_v63, %v241_v9  ;;  %v1935_v14 = vadd.f32 %v321_v0, %v241_v9  ;;  %v367_v63 = vmul.f32 0.044715, %v351_v30  ;;  %v384_v0 = vadd.f32 %v368_v32, %v1899_v38 }
 0x20b   :  { %v385_v6 = vadd.f32 %v369_v55, %v1903_v42  ;;  %v397_v30 = vmul.f32 0.7978846, %v381_v52  ;;  %v382_v32 = vadd.f32 %v366_v58, %v1905_v43  ;;  %v361_v52 = vmul.f32 0.044715, %v345_v21 }
 0x20c   :  { %v338_v25 = vmul.f32 %v1933_v4, %v1933_v4  ;;  %v339_v9 = vmul.f32 %v1935_v14, %v1935_v14  ;;  %v400_v55 = vmul.f32 0.7978846, %v384_v0  ;;  %v378_v58 = vadd.f32 %v362_v24, %v1916_v54 }
 0x20d   :  { %v377_v21 = vadd.f32 %v361_v52, %v1937_v15 }
 0x20e   :  { %v354_v39 = vmul.f32 %v338_v25, %v1933_v4  ;;  %v355_v44 = vmul.f32 %v339_v9, %v1935_v14  ;;  %v396_v25 = vmul.f32 0.7978846, %v380_v26 }
 0x210   :  { %v370_v60 = vmul.f32 0.044715, %v354_v39  ;;  %v371_v61 = vmul.f32 0.044715, %v355_v44  ;;  %1440 = vtanh.f32 %v396_v25  ;;  %v374_v25 = vadd.f32 %v358_v33, %v1897_v37 }
 0x211   :  { %v294_v2 = vpop.f32.mrf.mxu2  ;;  %v323_v7 = vpop.f32.mrf.mxu3  ;;  %1442 = vtanh.f32 %v397_v30 }
 0x212   :  { %v386_v9 = vadd.f32 %v370_v60, %v1933_v4  ;;  %v387_v8 = vadd.f32 %v371_v61, %v1935_v14  ;;  %v1966_v18 = vadd.f32 %v294_v2, %v1889_v20  ;;  %v1969_v19 = vadd.f32 %v323_v7, %v1889_v20 }
 0x213   :  { %v360_v60 = vmul.f32 0.044715, %v344_v56  ;;  %v363_v61 = vmul.f32 0.044715, %v347_v62  ;;  %v383_v20 = vadd.f32 %v367_v63, %v1908_v50  ;;  %v401_v7 = vmul.f32 0.7978846, %v385_v6 }
 0x214   :  { %v340_v26 = vmul.f32 %v1966_v18, %v1966_v18  ;;  %v341_v39 = vmul.f32 %v1969_v19, %v1969_v19  ;;  %v402_v44 = vmul.f32 0.7978846, %v386_v9  ;;  %v403_v2 = vmul.f32 0.7978846, %v387_v8 }
 0x215   :  { %v398_v9 = vmul.f32 0.7978846, %v382_v32  ;;  %v359_v56 = vmul.f32 0.044715, %v343_v36  ;;  %v379_v62 = vadd.f32 %v363_v61, %v1925_v59  ;;  %v399_v63 = vmul.f32 0.7978846, %v383_v20 }
 0x216   :  { %v356_v45 = vmul.f32 %v340_v26, %v1966_v18  ;;  %v357_v51 = vmul.f32 %v341_v39, %v1969_v19  ;;  %1444 = vtanh.f32 %v402_v44  ;;  %v376_v8 = vadd.f32 %v360_v60, %v1921_v57  ;;  %v1441_v24 = vpop.eup %1440 }
 0x217   :  { %1446 = vtanh.f32 %v403_v2  ;;  %v394_v36 = vmul.f32 0.7978846, %v378_v58  ;;  %v1443_v32 = vpop.eup %1442  ;;  %v375_v39 = vadd.f32 %v359_v56, %v1914_v53  ;;  %v395_v44 = vmul.f32 0.7978846, %v379_v62 }
 0x218   :  { %v372_v1 = vmul.f32 0.044715, %v356_v45  ;;  %v373_v49 = vmul.f32 0.044715, %v357_v51  ;;  %1448 = vtanh.f32 %v400_v55  ;;  %v393_v61 = vmul.f32 0.7978846, %v377_v21 }
 0x219   :  { %1450 = vtanh.f32 %v401_v7  ;;  %v390_v20 = vmul.f32 0.7978846, %v374_v25  ;;  %v391_v51 = vmul.f32 0.7978846, %v375_v39 }
 0x21a   :  { %v388_v26 = vadd.f32 %v372_v1, %v1966_v18  ;;  %v389_v0 = vadd.f32 %v373_v49, %v1969_v19  ;;  %1452 = vtanh.f32 %v398_v9  ;;  %v392_v1 = vmul.f32 0.7978846, %v376_v8 }
 0x21b   :  { %1454 = vtanh.f32 %v399_v63 }
 0x21c   :  { %v404_v6 = vmul.f32 0.7978846, %v388_v26  ;;  %v405_v30 = vmul.f32 0.7978846, %v389_v0  ;;  %v1445_v60 = vpop.eup %1444 }
 0x21d   :  { %v1447_v49 = vpop.eup %1446  ;;  %v434_v45 = vadd.f32 1.0, %v1445_v60 }
 0x21e   :  { %1456 = vtanh.f32 %v404_v6  ;;  %v1449_v33 = vpop.eup %1448  ;;  %v435_v52 = vadd.f32 1.0, %v1447_v49 }
 0x21f   :  { %1458 = vtanh.f32 %v405_v30  ;;  %v1451_v2 = vpop.eup %1450  ;;  %v432_v7 = vadd.f32 1.0, %v1449_v33  ;;  %v450_v8 = vmul.f32 0.5, %v434_v45 }
 0x220   :  { %1460 = vtanh.f32 %v394_v36  ;;  %v1453_v55 = vpop.eup %1452  ;;  %v433_v56 = vadd.f32 1.0, %v1451_v2  ;;  %v451_v21 = vmul.f32 0.5, %v435_v52 }
 0x221   :  { %1462 = vtanh.f32 %v395_v44  ;;  %v1455_v58 = vpop.eup %1454  ;;  %v430_v26 = vadd.f32 1.0, %v1453_v55  ;;  %v448_v39 = vmul.f32 0.5, %v432_v7  ;;  %v428_v44 = vadd.f32 1.0, %v1441_v24 }
 0x222   :  { %1464 = vtanh.f32 %v392_v1  ;;  %v431_v6 = vadd.f32 1.0, %v1455_v58  ;;  %v449_v49 = vmul.f32 0.5, %v433_v56 }
 0x223   :  { %1466 = vtanh.f32 %v393_v61  ;;  %v429_v61 = vadd.f32 1.0, %v1443_v32  ;;  %v446_v45 = vmul.f32 0.5, %v430_v26  ;;  %v444_v56 = vmul.f32 0.5, %v428_v44 }
 0x224   :  { %v1457_v9 = vpop.eup %1456  ;;  %1468 = vtanh.f32 %v390_v20  ;;  %v466_v20 = vmul.f32 %v450_v8, %v1933_v4  ;;  %v447_v58 = vmul.f32 0.5, %v431_v6  ;;  %v465_v4 = vmul.f32 %v449_v49, %v1903_v42 }
 0x225   :  { %v1459_v62 = vpop.eup %1458  ;;  %v436_v63 = vadd.f32 1.0, %v1457_v9  ;;  %1470 = vtanh.f32 %v391_v51  ;;  %v467_v9 = vmul.f32 %v451_v21, %v1935_v14  ;;  %v445_v8 = vmul.f32 0.5, %v429_v61 }
 0x226   :  { %v1461_v0 = vpop.eup %1460  ;;  %v437_v25 = vadd.f32 1.0, %v1459_v62  ;;  %v462_v26 = vmul.f32 %v446_v45, %v1905_v43 }
 0x227   :  { %v1463_v30 = vpop.eup %1462  ;;  %v452_v36 = vmul.f32 0.5, %v436_v63  ;;  %v426_v55 = vadd.f32 1.0, %v1461_v0  ;;  %v464_v63 = vmul.f32 %v448_v39, %v1899_v38  ;;  %v460_v38 = vmul.f32 %v444_v56, %v1891_v27 }
 0x228   :  { %v1465_v60 = vpop.eup %1464  ;;  %v453_v1 = vmul.f32 0.5, %v437_v25  ;;  %v427_v62 = vadd.f32 1.0, %v1463_v30  ;;  %v461_v44 = vmul.f32 %v445_v8, %v1893_v31  ;;  %v470_v31 = vld [vmem:[%s2413_s4] sm:$0xff]  ;;  %v2421_v8 = vld [vmem:[#allocation4_spill] sm:$0xff] }
 0x229   :  { %v1467_v33 = vpop.eup %1466  ;;  %v468_v2 = vmul.f32 %v452_v36, %v1966_v18  ;;  %v424_v32 = vadd.f32 1.0, %v1465_v60  ;;  %v442_v0 = vmul.f32 0.5, %v426_v55  ;;  %v476_v30 = vpack.c.bf16 %v464_v63, %v462_v26 }
 0x22a   :  { %v1469_v51 = vpop.eup %1468  ;;  %v469_v52 = vmul.f32 %v453_v1, %v1969_v19  ;;  %v425_v18 = vadd.f32 1.0, %v1467_v33  ;;  %v463_v19 = vmul.f32 %v447_v58, %v1908_v50  ;;  %v443_v21 = vmul.f32 0.5, %v427_v62 }
 0x22b   :  { %v1471_v7 = vpop.eup %1470  ;;  %v478_v24 = vpack.c.bf16 %v468_v2, %v466_v20  ;;  %v422_v14 = vadd.f32 1.0, %v1469_v51  ;;  %v440_v36 = vmul.f32 0.5, %v424_v32  ;;  %v458_v60 = vmul.f32 %v442_v0, %v1916_v54 }
 0x22c   :  { %v479_v25 = vpack.c.bf16 %v469_v52, %v467_v9  ;;  %v423_v6 = vadd.f32 1.0, %v1471_v7  ;;  %v477_v39 = vpack.c.bf16 %v465_v4, %v463_v19  ;;  %v441_v42 = vmul.f32 0.5, %v425_v18  ;;  %v2420_v4 = vld [vmem:[#allocation3_spill] sm:$0xff] }
 0x22d   :  { %488 = vmatpush.bf16.msrb.mxu0 %v478_v24  ;;  %v438_v1 = vmul.f32 0.5, %v422_v14  ;;  %v459_v43 = vmul.f32 %v443_v21, %v1925_v59  ;;  %v474_v61 = vpack.c.bf16 %v460_v38, %v458_v60  ;;  %v456_v50 = vmul.f32 %v440_v36, %v1921_v57  ;;  %v1366_v19 = vld [vmem:[%s2412_s3 + $0x40] sm:$0xff]  ;;  %v1367_v21 = vld [vmem:[%s2412_s3 + $0x48] sm:$0xff]  ;;  %v1369_v60 = vld [vmem:[%s2412_s3 + $0x58] sm:$0xff] }
 0x22e   :  { %501 = vmatpush.bf16.msrb.mxu1 %v479_v25  ;;  %v439_v49 = vmul.f32 0.5, %v423_v6  ;;  %v457_v20 = vmul.f32 %v441_v42, %v1937_v15  ;;  %v471_v59 = vpack.c.bf16 %v470_v31, %v470_v31  ;;  %v1368_v42 = vld [vmem:[%s2412_s3 + $0x50] sm:$0xff] }
 0x22f   :  { %v475_v33 = vpack.c.bf16 %v461_v44, %v459_v43  ;;  %v454_v27 = vmul.f32 %v438_v1, %v1897_v37  ;;  %v582_v44 = vpack.c.bf16 %v1367_v21, %v1366_v19  ;;  %v583_v1 = vpack.c.bf16 %v1369_v60, %v1368_v42  ;;  %v1370_v43 = vld [vmem:[%s2412_s3 + $0x60] sm:$0xff] }
 0x230   :  { %v455_v54 = vmul.f32 %v439_v49, %v1914_v53  ;;  %v1371_v49 = vld [vmem:[%s2412_s3 + $0x68] sm:$0xff] }
 0x231   :  { %489 = vmatpush.bf16.msrb.mxu0 %v476_v30  ;;  %v472_v2 = vpack.c.bf16 %v456_v50, %v454_v27  ;;  %v1372_v50 = vld [vmem:[%s2412_s3 + $0x70] sm:$0xff] }
 0x232   :  { %502 = vmatpush.bf16.msrb.mxu1 %v477_v39  ;;  %v473_v45 = vpack.c.bf16 %v457_v20, %v455_v54 }
 0x235   :  { %490 = vmatpush.bf16.msrb.mxu0 %v474_v61  ;;  %v584_v61 = vpack.c.bf16 %v1371_v49, %v1370_v43 }
 0x236   :  { %503 = vmatpush.bf16.msrb.mxu1 %v475_v33  ;;  %v1373_v33 = vld [vmem:[%s2412_s3 + $0x78] sm:$0xff] }
 0x237   :  { %v585_v20 = vpack.c.bf16 %v1373_v33, %v1372_v50 }
 0x239   :  { %491 = vmatpush.bf16.msrb.mxu0 %v472_v2 }
 0x23a   :  { %504 = vmatpush.bf16.msrb.mxu1 %v473_v45 }
 0x23c   :  { %1364 = vmatmul.msk.bf16.vlgmr.msrb.gmra.mxu0 %vm480_vm2, %v471_v59 }
 0x23d   :  { %541 = vmatpush.bf16.msra.mxu0 %v1583_v3  ;;  %1365 = vmatmul.msk.bf16.vlgmr.msrb.gmra.mxu1 %vm480_vm2, %v471_v59 }
 0x23e   :  { %554 = vmatpush.bf16.msra.mxu1 %v1588_v5 }
 0x241   :  { %542 = vmatpush.bf16.msra.mxu0 %v1606_v10 }
 0x242   :  { %555 = vmatpush.bf16.msra.mxu1 %v1608_v11 }
 0x245   :  { %543 = vmatpush.bf16.msra.mxu0 %v1624_v16 }
 0x246   :  { %556 = vmatpush.bf16.msra.mxu1 %v1626_v17 }
 0x249   :  { %544 = vmatpush.bf16.msra.mxu0 %v1644_v22 }
 0x24a   :  { %557 = vmatpush.bf16.msra.mxu1 %v1646_v23 }
 0x24d   :  { %545 = vmatpush.bf16.msra.mxu0 %v1662_v28 }
 0x24e   :  { %558 = vmatpush.bf16.msra.mxu1 %v1664_v29 }
 0x251   :  { %546 = vmatpush.bf16.msra.mxu0 %v1682_v34 }
 0x252   :  { %559 = vmatpush.bf16.msra.mxu1 %v1684_v35 }
 0x255   :  { %547 = vmatpush.bf16.msra.mxu0 %v1700_v40 }
 0x256   :  { %560 = vmatpush.bf16.msra.mxu1 %v1702_v41 }
 0x259   :  { %548 = vmatpush.bf16.msra.mxu0 %v1720_v46 }
 0x25a   :  { %561 = vmatpush.bf16.msra.mxu1 %v1722_v47 }
 0x2b9   :  { %v493_v37 = vpop.f32.mrf.mxu0 }
 0x2ba   :  { %v510_v53 = vadd.f32 %v493_v37, %v1776_v12  ;;  %v506_v57 = vpop.f32.mrf.mxu1  ;;  %v630_v37 = vpop.permute.xlu2 %629 }
 0x2bb   :  { %v511_v15 = vadd.f32 %v506_v57, %v1779_v13 }
 0x2bc   :  { %v512_v55 = vpack.c.bf16 %v510_v53, %v510_v53 }
 0x2bd   :  { %v513_v51 = vpack.c.bf16 %v511_v15, %v511_v15 }
 0x2be   :  { %522 = vmatmul.bf16.vlgmr.msra.gmra.mxu2 %v512_v55  ;;  %v2090_v55 = vpop.permute.xlu0 %634 }
 0x2bf   :  { %535 = vmatmul.bf16.vlgmr.msra.gmra.mxu3 %v513_v51 }
 0x2c1   :  { %v495_v9 = vpop.f32.mrf.mxu0 }
 0x2c2   :  { %v508_v52 = vpop.f32.mrf.mxu1  ;;  %v625_v51 = vpop.permute.xlu2 %624 }
 0x341   :  { %v523_v58 = vpop.f32.mrf.mxu2 }
 0x342   :  { %v536_v62 = vpop.f32.mrf.mxu3 }
 0x343   :  { %v537_v7 = vadd.f32 %v536_v62, %v523_v58  ;;  %v610_v62 = vpop.permute.xlu0 %609 }
 0x345   :  { %v540_v24 = vpack.c.bf16 %v537_v7, %v537_v7 }
 0x347   :  { %549 = vmatmul.bf16.vlgmr.msra.gmra.mxu0 %v540_v24  ;;  %562 = vmatmul.bf16.vlgmr.msra.gmra.mxu1 %v540_v24 }
 0x349   :  { %v525_v63 = vpop.f32.mrf.mxu2 }
 0x34a   :  { %v538_v56 = vpop.f32.mrf.mxu3  ;;  %v600_v63 = vpop.permute.xlu2 %599 }
 0x3c4   :  { %v550_v32 = vpop.f32.mrf.mxu0  ;;  %v563_v25 = vpop.f32.mrf.mxu1 }
 0x3c5   :  { %v567_v12 = vsub.f32 %v550_v32, %v1736_v48  ;;  %v568_v13 = vsub.f32 %v563_v25, %v2420_v4 }
 0x3c7   :  { %v569_v18 = vmul.f32 %v567_v12, %v2421_v8  ;;  %v570_v26 = vmul.f32 %v568_v13, %v2421_v8 }
 0x3c9   :  { %v2032_v0 = vadd.f32 %v569_v18, %v510_v53  ;;  %v2034_v14 = vadd.f32 %v570_v26, %v511_v15  ;;  %v620_v15 = vpop.permute.xlu1 %619 }
 0x3cb   :  { %v586_v48 = vpack.c.bf16 %v2032_v0, %v2032_v0  ;;  %v587_v6 = vpack.c.bf16 %v2034_v14, %v2034_v14 }
 0x3cc   :  { %v552_v30 = vpop.f32.mrf.mxu0  ;;  %v565_v38 = vpop.f32.mrf.mxu1 }
 0x3cd   :  { %v650_v36 = vsel %vm261_vm0, %v586_v48, 0  ;;  %v653_v39 = vsel %vm261_vm0, %v587_v6, 0  ;;  %v605_v38 = vpop.permute.xlu0 %604 }
 0x3ce   :  { %662 = vmatpush.bf16.msrb.mxu0 %v650_v36  ;;  %691 = vmatpush.bf16.msrb.mxu1 %v653_v39 }
 0x3d1   :  { %1382 = vmatmul.msk.bf16.vlgmr.msrb.gmra.mxu0 %vm248_vm1, %v582_v44  ;;  %1386 = vmatmul.msk.bf16.vlgmr.msrb.gmra.mxu1 %vm248_vm1, %v582_v44  ;;  %v615_v58 = vpop.permute.xlu1 %614 }
 0x3d2   :  { %901 = vmatpush.bf16.xpose.msra.mxu0 %v1583_v3  ;;  %914 = vmatpush.bf16.xpose.msra.mxu1 %v1588_v5 }
 0x3da   :  { %902 = vmatpush.bf16.xpose.msra.mxu0 %v1606_v10  ;;  %915 = vmatpush.bf16.xpose.msra.mxu1 %v1608_v11 }
 0x3e1   :  { %1383 = vmatmul.msk.bf16.gmra.mxu0 %vm248_vm1, %v583_v1  ;;  %1387 = vmatmul.msk.bf16.gmra.mxu1 %vm248_vm1, %v583_v1 }
 0x3e2   :  { %903 = vmatpush.bf16.xpose.msra.mxu0 %v1624_v16  ;;  %916 = vmatpush.bf16.xpose.msra.mxu1 %v1626_v17 }
 0x3ea   :  { %904 = vmatpush.bf16.xpose.msra.mxu0 %v1644_v22  ;;  %917 = vmatpush.bf16.xpose.msra.mxu1 %v1646_v23 }
 0x3f1   :  { %1384 = vmatmul.msk.bf16.gmra.mxu0 %vm248_vm1, %v584_v61  ;;  %1388 = vmatmul.msk.bf16.gmra.mxu1 %vm248_vm1, %v584_v61 }
 0x3f2   :  { %905 = vmatpush.bf16.xpose.msra.mxu0 %v1662_v28  ;;  %918 = vmatpush.bf16.xpose.msra.mxu1 %v1664_v29 }
 0x3fa   :  { %906 = vmatpush.bf16.xpose.msra.mxu0 %v1682_v34  ;;  %919 = vmatpush.bf16.xpose.msra.mxu1 %v1684_v35 }
 0x401   :  { %1385 = vmatmul.msk.bf16.gmra.mxu0 %vm248_vm1, %v585_v20  ;;  %1389 = vmatmul.msk.bf16.gmra.mxu1 %vm248_vm1, %v585_v20 }
 0x402   :  { %907 = vmatpush.bf16.xpose.msra.mxu0 %v1700_v40  ;;  %920 = vmatpush.bf16.xpose.msra.mxu1 %v1702_v41 }
 0x40a   :  { %908 = vmatpush.bf16.xpose.msra.mxu0 %v1720_v46  ;;  %921 = vmatpush.bf16.xpose.msra.mxu1 %v1722_v47 }
 0x44e   :  { %v664_v27 = vpop.f32.mrf.mxu0  ;;  %v693_v31 = vpop.f32.mrf.mxu1 }
 0x44f   :  { %v2098_v12 = vadd.f32 %v664_v27, %v600_v63  ;;  %v2115_v30 = vadd.f32 %v693_v31, %v600_v63 }
 0x451   :  { %v713_v6 = vmul.f32 %v2098_v12, %v2098_v12  ;;  %v714_v27 = vmul.f32 %v2115_v30, %v2115_v30 }
 0x453   :  { %v729_v20 = vmul.f32 %v713_v6, %v2098_v12 }
 0x455   :  { %v745_v63 = vmul.f32 0.044715, %v729_v20 }
 0x456   :  { %v666_v54 = vpop.f32.mrf.mxu0  ;;  %v695_v2 = vpop.f32.mrf.mxu1 }
 0x457   :  { %v2122_v42 = vadd.f32 %v666_v54, %v605_v38 }
 0x45e   :  { %v669_v45 = vpop.f32.mrf.mxu0  ;;  %v698_v59 = vpop.f32.mrf.mxu1 }
 0x45f   :  { %v2117_v36 = vadd.f32 %v669_v45, %v610_v62  ;;  %v2126_v1 = vadd.f32 %v698_v59, %v610_v62  ;;  %v2138_v45 = vadd.f32 %v695_v2, %v605_v38 }
 0x461   :  { %v717_v59 = vmul.f32 %v2117_v36, %v2117_v36  ;;  %v718_v2 = vmul.f32 %v2126_v1, %v2126_v1 }
 0x466   :  { %v671_v53 = vpop.f32.mrf.mxu0  ;;  %v700_v57 = vpop.f32.mrf.mxu1 }
 0x467   :  { %v2092_v7 = vadd.f32 %v671_v53, %v615_v58  ;;  %v2094_v24 = vadd.f32 %v700_v57, %v615_v58 }
 0x469   :  { %v719_v56 = vmul.f32 %v2092_v7, %v2092_v7  ;;  %v720_v13 = vmul.f32 %v2094_v24, %v2094_v24 }
 0x46b   :  { %v735_v19 = vmul.f32 %v719_v56, %v2092_v7  ;;  %v736_v39 = vmul.f32 %v720_v13, %v2094_v24  ;;  %v730_v56 = vmul.f32 %v714_v27, %v2115_v30  ;;  %v716_v13 = vmul.f32 %v2138_v45, %v2138_v45 }
 0x46d   :  { %v751_v43 = vmul.f32 0.044715, %v735_v19  ;;  %v752_v53 = vmul.f32 0.044715, %v736_v39  ;;  %v733_v19 = vmul.f32 %v717_v59, %v2117_v36 }
 0x46e   :  { %v674_v9 = vpop.f32.mrf.mxu0  ;;  %v703_v52 = vpop.f32.mrf.mxu1 }
 0x46f   :  { %v2106_v26 = vadd.f32 %v674_v9, %v620_v15  ;;  %v2109_v21 = vadd.f32 %v703_v52, %v620_v15  ;;  %v715_v15 = vmul.f32 %v2122_v42, %v2122_v42  ;;  %v767_v52 = vadd.f32 %v751_v43, %v2092_v7 }
 0x470   :  { %v734_v43 = vmul.f32 %v718_v2, %v2126_v1 }
 0x471   :  { %v721_v60 = vmul.f32 %v2106_v26, %v2106_v26  ;;  %v722_v49 = vmul.f32 %v2109_v21, %v2109_v21  ;;  %v731_v38 = vmul.f32 %v715_v15, %v2122_v42  ;;  %v732_v15 = vmul.f32 %v716_v13, %v2138_v45 }
 0x473   :  { %v738_v58 = vmul.f32 %v722_v49, %v2109_v21  ;;  %v783_v49 = vmul.f32 0.7978846, %v767_v52 }
 0x475   :  { %1472 = vtanh.f32 %v783_v49 }
 0x476   :  { %v676_v32 = vpop.f32.mrf.mxu0  ;;  %v705_v25 = vpop.f32.mrf.mxu1 }
 0x477   :  { %v2100_v4 = vadd.f32 %v676_v32, %v625_v51  ;;  %v2104_v18 = vadd.f32 %v705_v25, %v625_v51  ;;  %v737_v51 = vmul.f32 %v721_v60, %v2106_v26 }
 0x479   :  { %v723_v48 = vmul.f32 %v2100_v4, %v2100_v4  ;;  %v724_v44 = vmul.f32 %v2104_v18, %v2104_v18  ;;  %v753_v39 = vmul.f32 0.044715, %v737_v51  ;;  %v749_v51 = vmul.f32 0.044715, %v733_v19 }
 0x47b   :  { %v739_v61 = vmul.f32 %v723_v48, %v2100_v4  ;;  %v740_v57 = vmul.f32 %v724_v44, %v2104_v18  ;;  %v768_v48 = vadd.f32 %v752_v53, %v2094_v24  ;;  %v769_v2 = vadd.f32 %v753_v39, %v2106_v26 }
 0x47c   :  { %v765_v39 = vadd.f32 %v749_v51, %v2117_v36 }
 0x47d   :  { %v755_v62 = vmul.f32 0.044715, %v739_v61  ;;  %v756_v6 = vmul.f32 0.044715, %v740_v57  ;;  %v754_v61 = vmul.f32 0.044715, %v738_v58 }
 0x47e   :  { %v679_v50 = vpop.f32.mrf.mxu0  ;;  %v708_v33 = vpop.f32.mrf.mxu1 }
 0x47f   :  { %v2134_v31 = vadd.f32 %v679_v50, %v630_v37  ;;  %v2136_v54 = vadd.f32 %v708_v33, %v630_v37  ;;  %v771_v50 = vadd.f32 %v755_v62, %v2100_v4 }
 0x481   :  { %v725_v9 = vmul.f32 %v2134_v31, %v2134_v31  ;;  %v726_v37 = vmul.f32 %v2136_v54, %v2136_v54  ;;  %v787_v13 = vmul.f32 0.7978846, %v771_v50 }
 0x483   :  { %v741_v32 = vmul.f32 %v725_v9, %v2134_v31  ;;  %v742_v25 = vmul.f32 %v726_v37, %v2136_v54  ;;  %v784_v9 = vmul.f32 0.7978846, %v768_v48  ;;  %v772_v37 = vadd.f32 %v756_v6, %v2104_v18 }
 0x484   :  { %v748_v6 = vmul.f32 0.044715, %v732_v15  ;;  %v761_v15 = vadd.f32 %v745_v63, %v2098_v12 }
 0x485   :  { %v757_v44 = vmul.f32 0.044715, %v741_v32  ;;  %v758_v60 = vmul.f32 0.044715, %v742_v25  ;;  %v747_v32 = vmul.f32 0.044715, %v731_v38  ;;  %1474 = vtanh.f32 %v784_v9  ;;  %v1473_v9 = vpop.eup %1472 }
 0x486   :  { %v681_v33 = vpop.f32.mrf.mxu0  ;;  %v710_v20 = vpop.f32.mrf.mxu1  ;;  %v750_v25 = vmul.f32 0.044715, %v734_v43  ;;  %v746_v38 = vmul.f32 0.044715, %v730_v56  ;;  %v764_v51 = vadd.f32 %v748_v6, %v2138_v45 }
 0x487   :  { %v773_v27 = vadd.f32 %v757_v44, %v2134_v31  ;;  %v774_v59 = vadd.f32 %v758_v60, %v2136_v54  ;;  %v2167_v53 = vadd.f32 %v681_v33, %v2090_v55  ;;  %v2170_v57 = vadd.f32 %v710_v20, %v2090_v55 }
 0x488   :  { %v770_v55 = vadd.f32 %v754_v61, %v2109_v21  ;;  %v788_v60 = vmul.f32 0.7978846, %v772_v37  ;;  %v785_v33 = vmul.f32 0.7978846, %v769_v2  ;;  %v766_v43 = vadd.f32 %v750_v25, %v2126_v1 }
 0x489   :  { %v789_v52 = vmul.f32 0.7978846, %v773_v27  ;;  %v727_v58 = vmul.f32 %v2167_v53, %v2167_v53  ;;  %v728_v62 = vmul.f32 %v2170_v57, %v2170_v57  ;;  %v790_v44 = vmul.f32 0.7978846, %v774_v59 }
 0x48a   :  { %v786_v61 = vmul.f32 0.7978846, %v770_v55  ;;  %v763_v49 = vadd.f32 %v747_v32, %v2122_v42  ;;  %v781_v37 = vmul.f32 0.7978846, %v765_v39 }
 0x48b   :  { %v743_v19 = vmul.f32 %v727_v58, %v2167_v53  ;;  %v744_v48 = vmul.f32 %v728_v62, %v2170_v57  ;;  %1476 = vtanh.f32 %v789_v52  ;;  %v1475_v52 = vpop.eup %1474  ;;  %v762_v58 = vadd.f32 %v746_v38, %v2115_v30 }
 0x48c   :  { %1478 = vtanh.f32 %v790_v44  ;;  %v782_v62 = vmul.f32 0.7978846, %v766_v43  ;;  %v779_v25 = vmul.f32 0.7978846, %v763_v49  ;;  %v780_v44 = vmul.f32 0.7978846, %v764_v51 }
 0x48d   :  { %v759_v20 = vmul.f32 0.044715, %v743_v19  ;;  %v760_v27 = vmul.f32 0.044715, %v744_v48  ;;  %1480 = vtanh.f32 %v787_v13  ;;  %v777_v13 = vmul.f32 0.7978846, %v761_v15 }
 0x48e   :  { %1482 = vtanh.f32 %v788_v60  ;;  %v778_v48 = vmul.f32 0.7978846, %v762_v58 }
 0x48f   :  { %v775_v50 = vadd.f32 %v759_v20, %v2167_v53  ;;  %v776_v59 = vadd.f32 %v760_v27, %v2170_v57  ;;  %1484 = vtanh.f32 %v785_v33 }
 0x490   :  { %1486 = vtanh.f32 %v786_v61 }
 0x491   :  { %v791_v56 = vmul.f32 0.7978846, %v775_v50  ;;  %v792_v2 = vmul.f32 0.7978846, %v776_v59  ;;  %v1477_v32 = vpop.eup %1476 }
 0x492   :  { %v1479_v55 = vpop.eup %1478  ;;  %v821_v6 = vadd.f32 1.0, %v1477_v32 }
 0x493   :  { %1488 = vtanh.f32 %v791_v56  ;;  %v1481_v63 = vpop.eup %1480  ;;  %v822_v60 = vadd.f32 1.0, %v1479_v55 }
 0x494   :  { %1490 = vtanh.f32 %v792_v2  ;;  %v1483_v19 = vpop.eup %1482  ;;  %v819_v20 = vadd.f32 1.0, %v1481_v63  ;;  %v837_v61 = vmul.f32 0.5, %v821_v6 }
 0x495   :  { %1492 = vtanh.f32 %v781_v37  ;;  %v1485_v39 = vpop.eup %1484  ;;  %v820_v38 = vadd.f32 1.0, %v1483_v19  ;;  %v838_v15 = vmul.f32 0.5, %v822_v60 }
 0x496   :  { %1494 = vtanh.f32 %v782_v62  ;;  %v1487_v33 = vpop.eup %1486  ;;  %v817_v50 = vadd.f32 1.0, %v1485_v39  ;;  %v835_v58 = vmul.f32 0.5, %v819_v20  ;;  %v815_v62 = vadd.f32 1.0, %v1473_v9 }
 0x497   :  { %1496 = vtanh.f32 %v779_v25  ;;  %v818_v37 = vadd.f32 1.0, %v1487_v33  ;;  %v836_v55 = vmul.f32 0.5, %v820_v38  ;;  %v854_v60 = vmul.f32 %v838_v15, %v2136_v54 }
 0x498   :  { %1498 = vtanh.f32 %v780_v44  ;;  %v816_v44 = vadd.f32 1.0, %v1475_v52  ;;  %v831_v38 = vmul.f32 0.5, %v815_v62 }
 0x499   :  { %v1489_v27 = vpop.eup %1488  ;;  %1500 = vtanh.f32 %v777_v13  ;;  %v853_v13 = vmul.f32 %v837_v61, %v2134_v31  ;;  %v852_v31 = vmul.f32 %v836_v55, %v2104_v18 }
 0x49a   :  { %v1491_v43 = vpop.eup %1490  ;;  %1502 = vtanh.f32 %v778_v48  ;;  %v823_v49 = vadd.f32 1.0, %v1489_v27  ;;  %v833_v48 = vmul.f32 0.5, %v817_v50  ;;  %v834_v27 = vmul.f32 0.5, %v818_v37 }
 0x49b   :  { %v1493_v59 = vpop.eup %1492  ;;  %v824_v51 = vadd.f32 1.0, %v1491_v43  ;;  %v832_v61 = vmul.f32 0.5, %v816_v44 }
 0x49c   :  { %v1495_v56 = vpop.eup %1494  ;;  %v839_v2 = vmul.f32 0.5, %v823_v49  ;;  %v813_v6 = vadd.f32 1.0, %v1493_v59  ;;  %v851_v49 = vmul.f32 %v835_v58, %v2100_v4  ;;  %v849_v50 = vmul.f32 %v833_v48, %v2106_v26 }
 0x49d   :  { %v1497_v32 = vpop.eup %1496  ;;  %v840_v25 = vmul.f32 0.5, %v824_v51  ;;  %v814_v43 = vadd.f32 1.0, %v1495_v56  ;;  %v847_v4 = vmul.f32 %v831_v38, %v2092_v7  ;;  %v848_v62 = vmul.f32 %v832_v61, %v2094_v24  ;;  %v1390_v24 = vld [vmem:[%s2413_s4 + $0x8] sm:$0xff]  ;;  %v1397_v61 = vld [vmem:[%s2412_s3 + $0xa0] sm:$0xff] }
 0x49e   :  { %v1499_v63 = vpop.eup %1498  ;;  %v855_v19 = vmul.f32 %v839_v2, %v2167_v53  ;;  %v811_v52 = vadd.f32 1.0, %v1497_v32  ;;  %v829_v59 = vmul.f32 0.5, %v813_v6  ;;  %v864_v56 = vpack.c.bf16 %v851_v49, %v849_v50 }
 0x49f   :  { %v1501_v39 = vpop.eup %1500  ;;  %v856_v33 = vmul.f32 %v840_v25, %v2170_v57  ;;  %v812_v53 = vadd.f32 1.0, %v1499_v63  ;;  %v850_v57 = vmul.f32 %v834_v27, %v2109_v21  ;;  %v830_v15 = vmul.f32 0.5, %v814_v43 }
 0x4a0   :  { %v1503_v20 = vpop.eup %1502  ;;  %v866_v9 = vpack.c.bf16 %v855_v19, %v853_v13  ;;  %v809_v54 = vadd.f32 1.0, %v1501_v39  ;;  %v827_v2 = vmul.f32 0.5, %v811_v52  ;;  %v845_v32 = vmul.f32 %v829_v59, %v2117_v36  ;;  %v1395_v52 = vld [vmem:[%s2412_s3 + $0x90] sm:$0xff] }
 0x4a1   :  { %v867_v51 = vpack.c.bf16 %v856_v33, %v854_v60  ;;  %v810_v37 = vadd.f32 1.0, %v1503_v20  ;;  %v865_v58 = vpack.c.bf16 %v852_v31, %v850_v57  ;;  %v828_v18 = vmul.f32 0.5, %v812_v53  ;;  %v1393_v60 = vld [vmem:[%s2412_s3 + $0x80] sm:$0xff]  ;;  %v1394_v33 = vld [vmem:[%s2412_s3 + $0x88] sm:$0xff]  ;;  %v1399_v59 = vld [vmem:[%s2412_s3 + $0xb0] sm:$0xff] }
 0x4a2   :  { %875 = vmatpush.bf16.msrb.mxu2 %v866_v9  ;;  %v825_v25 = vmul.f32 0.5, %v809_v54  ;;  %v846_v26 = vmul.f32 %v830_v15, %v2126_v1  ;;  %v862_v44 = vpack.c.bf16 %v847_v4, %v845_v32  ;;  %v843_v21 = vmul.f32 %v827_v2, %v2122_v42  ;;  %v1398_v53 = vld [vmem:[%s2412_s3 + $0xa8] sm:$0xff]  ;;  %v1400_v54 = vld [vmem:[%s2412_s3 + $0xb8] sm:$0xff] }
 0x4a3   :  { %888 = vmatpush.bf16.msrb.mxu3 %v867_v51  ;;  %v826_v55 = vmul.f32 0.5, %v810_v37  ;;  %v844_v13 = vmul.f32 %v828_v18, %v2138_v45  ;;  %v859_v1 = vpack.c.bf16 %v1390_v24, %v1390_v24  ;;  %v969_v38 = vpack.c.bf16 %v1394_v33, %v1393_v60  ;;  %v1396_v51 = vld [vmem:[%s2412_s3 + $0x98] sm:$0xff] }
 0x4a4   :  { %v863_v63 = vpack.c.bf16 %v848_v62, %v846_v26  ;;  %v841_v7 = vmul.f32 %v825_v25, %v2098_v12  ;;  %v1537_v12 = vld [vmem:[%s2409_s1 + $0x8] sm:$0xff]  ;;  %v970_v31 = vpack.c.bf16 %v1396_v51, %v1395_v52  ;;  %v971_v50 = vpack.c.bf16 %v1398_v53, %v1397_v61  ;;  %v1017_v62 = vpop.permute.xlu1 %1016  ;;  %v1007_v25 = vpop.permute.xlu0 %1006 }
 0x4a5   :  { %v842_v36 = vmul.f32 %v826_v55, %v2115_v30  ;;  %v972_v57 = vpack.c.bf16 %v1400_v54, %v1399_v59  ;;  %v2279_v26 = vpop.permute.xlu2 %1021 }
 0x4a6   :  { %876 = vmatpush.bf16.msrb.mxu2 %v864_v56  ;;  %v860_v19 = vpack.c.bf16 %v843_v21, %v841_v7 }
 0x4a7   :  { %889 = vmatpush.bf16.msrb.mxu3 %v865_v58  ;;  %v861_v48 = vpack.c.bf16 %v844_v13, %v842_v36 }
 0x4aa   :  { %877 = vmatpush.bf16.msrb.mxu2 %v862_v44 }
 0x4ab   :  { %890 = vmatpush.bf16.msrb.mxu3 %v863_v63 }
 0x4ac   :  { %v1012_v55 = vpop.permute.xlu1 %1011  ;;  %v1002_v63 = vpop.permute.xlu0 %1001 }
 0x4ad   :  { %v997_v13 = vpop.permute.xlu2 %996 }
 0x4ae   :  { %878 = vmatpush.bf16.msrb.mxu2 %v860_v19 }
 0x4af   :  { %891 = vmatpush.bf16.msrb.mxu3 %v861_v48 }
 0x4b1   :  { %1391 = vmatmul.msk.bf16.vlgmr.msrb.gmra.mxu2 %vm480_vm2, %v859_v1 }
 0x4b2   :  { %928 = vmatpush.bf16.msra.mxu2 %v1583_v3  ;;  %1392 = vmatmul.msk.bf16.vlgmr.msrb.gmra.mxu3 %vm480_vm2, %v859_v1 }
 0x4b3   :  { %941 = vmatpush.bf16.msra.mxu3 %v1588_v5 }
 0x4b4   :  { %v987_v36 = vpop.permute.xlu1 %986 }
 0x4b6   :  { %929 = vmatpush.bf16.msra.mxu2 %v1606_v10 }
 0x4b7   :  { %942 = vmatpush.bf16.msra.mxu3 %v1608_v11 }
 0x4ba   :  { %930 = vmatpush.bf16.msra.mxu2 %v1624_v16 }
 0x4bb   :  { %943 = vmatpush.bf16.msra.mxu3 %v1626_v17 }
 0x4be   :  { %931 = vmatpush.bf16.msra.mxu2 %v1644_v22 }
 0x4bf   :  { %944 = vmatpush.bf16.msra.mxu3 %v1646_v23 }
 0x4c2   :  { %932 = vmatpush.bf16.msra.mxu2 %v1662_v28 }
 0x4c3   :  { %945 = vmatpush.bf16.msra.mxu3 %v1664_v29 }
 0x4c6   :  { %933 = vmatpush.bf16.msra.mxu2 %v1682_v34 }
 0x4c7   :  { %946 = vmatpush.bf16.msra.mxu3 %v1684_v35 }
 0x4ca   :  { %934 = vmatpush.bf16.msra.mxu2 %v1700_v40 }
 0x4cb   :  { %947 = vmatpush.bf16.msra.mxu3 %v1702_v41 }
 0x4ce   :  { %935 = vmatpush.bf16.msra.mxu2 %v1720_v46 }
 0x4cf   :  { %948 = vmatpush.bf16.msra.mxu3 %v1722_v47 }
 0x534   :  { %v880_v3 = vpop.f32.mrf.mxu2 }
 0x535   :  { %v897_v5 = vadd.f32 %v880_v3, %v2032_v0  ;;  %v893_v10 = vpop.f32.mrf.mxu3  ;;  %v1536_v0 = vld [vmem:[%s2409_s1] sm:$0xff] }
 0x536   :  { %v898_v11 = vadd.f32 %v893_v10, %v2034_v14 }
 0x537   :  { %v899_v16 = vpack.c.bf16 %v897_v5, %v897_v5 }
 0x538   :  { %v900_v17 = vpack.c.bf16 %v898_v11, %v898_v11 }
 0x539   :  { %909 = vmatmul.bf16.vlgmr.msra.gmra.mxu0 %v899_v16 }
 0x53a   :  { %922 = vmatmul.bf16.vlgmr.msra.gmra.mxu1 %v900_v17 }
 0x53c   :  { %v882_v22 = vpop.f32.mrf.mxu2 }
 0x53d   :  { %v895_v23 = vpop.f32.mrf.mxu3 }
 0x5b6   :  { %v910_v28 = vpop.f32.mrf.mxu0 }
 0x5b7   :  { %v923_v29 = vpop.f32.mrf.mxu1 }
 0x5b8   :  { %v924_v34 = vadd.f32 %v923_v29, %v910_v28 }
 0x5ba   :  { %v927_v35 = vpack.c.bf16 %v924_v34, %v924_v34  ;;  %v992_v34 = vpop.permute.xlu2 %991 }
 0x5bc   :  { %936 = vmatmul.bf16.vlgmr.msra.gmra.mxu2 %v927_v35  ;;  %949 = vmatmul.bf16.vlgmr.msra.gmra.mxu3 %v927_v35 }
 0x5be   :  { %v912_v40 = vpop.f32.mrf.mxu0 }
 0x5bf   :  { %v925_v41 = vpop.f32.mrf.mxu1 }
 0x63f   :  { %v937_v46 = vpop.f32.mrf.mxu2  ;;  %v950_v47 = vpop.f32.mrf.mxu3 }
 0x640   :  { %v954_v14 = vsub.f32 %v937_v46, %v1536_v0  ;;  %v955_v30 = vsub.f32 %v950_v47, %v1537_v12 }
 0x642   :  { %v956_v42 = vmul.f32 %v954_v14, %v2421_v8  ;;  %v957_v45 = vmul.f32 %v955_v30, %v2421_v8 }
 0x644   :  { %v2237_v6 = vadd.f32 %v956_v42, %v897_v5  ;;  %v2239_v39 = vadd.f32 %v957_v45, %v898_v11 }
 0x646   :  { %v973_v27 = vpack.c.bf16 %v2237_v6, %v2237_v6  ;;  %v974_v43 = vpack.c.bf16 %v2239_v39, %v2239_v39 }
 0x647   :  { %v939_v20 = vpop.f32.mrf.mxu2  ;;  %v952_v8 = vpop.f32.mrf.mxu3 }
 0x648   :  { %v1037_v9 = vsel %vm261_vm0, %v973_v27, 0  ;;  %v1040_v49 = vsel %vm261_vm0, %v974_v43, 0 }
 0x649   :  { %1049 = vmatpush.bf16.msrb.mxu2 %v1037_v9  ;;  %1078 = vmatpush.bf16.msrb.mxu3 %v1040_v49 }
 0x64c   :  { %1409 = vmatmul.msk.bf16.vlgmr.msrb.gmra.mxu2 %vm248_vm1, %v969_v38  ;;  %1413 = vmatmul.msk.bf16.vlgmr.msrb.gmra.mxu3 %vm248_vm1, %v969_v38 }
 0x65c   :  { %1410 = vmatmul.msk.bf16.gmra.mxu2 %vm248_vm1, %v970_v31  ;;  %1414 = vmatmul.msk.bf16.gmra.mxu3 %vm248_vm1, %v970_v31 }
 0x66c   :  { %1411 = vmatmul.msk.bf16.gmra.mxu2 %vm248_vm1, %v971_v50  ;;  %1415 = vmatmul.msk.bf16.gmra.mxu3 %vm248_vm1, %v971_v50 }
 0x67c   :  { %1412 = vmatmul.msk.bf16.gmra.mxu2 %vm248_vm1, %v972_v57  ;;  %1416 = vmatmul.msk.bf16.gmra.mxu3 %vm248_vm1, %v972_v57 }
 0x6cf   :  { %v1051_v15 = vpop.f32.mrf.mxu2  ;;  %v1080_v37 = vpop.f32.mrf.mxu3 }
 0x6d0   :  { %v2287_v3 = vadd.f32 %v1051_v15, %v987_v36  ;;  %v2304_v29 = vadd.f32 %v1080_v37, %v987_v36 }
 0x6d2   :  { %v1100_v28 = vmul.f32 %v2287_v3, %v2287_v3  ;;  %v1101_v33 = vmul.f32 %v2304_v29, %v2304_v29 }
 0x6d4   :  { %v1116_v60 = vmul.f32 %v1100_v28, %v2287_v3  ;;  %v1117_v57 = vmul.f32 %v1101_v33, %v2304_v29 }
 0x6d6   :  { %v1132_v54 = vmul.f32 0.044715, %v1116_v60 }
 0x6d7   :  { %v1053_v56 = vpop.f32.mrf.mxu2  ;;  %v1082_v4 = vpop.f32.mrf.mxu3 }
 0x6d8   :  { %v2311_v46 = vadd.f32 %v1053_v56, %v992_v34  ;;  %v2327_v20 = vadd.f32 %v1082_v4, %v992_v34 }
 0x6da   :  { %v1102_v38 = vmul.f32 %v2311_v46, %v2311_v46  ;;  %v1103_v56 = vmul.f32 %v2327_v20, %v2327_v20 }
 0x6df   :  { %v1056_v2 = vpop.f32.mrf.mxu2  ;;  %v1085_v58 = vpop.f32.mrf.mxu3 }
 0x6e0   :  { %v2306_v35 = vadd.f32 %v1056_v2, %v997_v13  ;;  %v2315_v0 = vadd.f32 %v1085_v58, %v997_v13 }
 0x6e2   :  { %v1104_v8 = vmul.f32 %v2306_v35, %v2306_v35  ;;  %v1105_v61 = vmul.f32 %v2315_v0, %v2315_v0 }
 0x6e4   :  { %v1120_v4 = vmul.f32 %v1104_v8, %v2306_v35 }
 0x6e7   :  { %v1058_v18 = vpop.f32.mrf.mxu2  ;;  %v1087_v32 = vpop.f32.mrf.mxu3 }
 0x6e8   :  { %v2281_v7 = vadd.f32 %v1058_v18, %v1002_v63  ;;  %v2283_v24 = vadd.f32 %v1087_v32, %v1002_v63 }
 0x6ea   :  { %v1106_v19 = vmul.f32 %v2281_v7, %v2281_v7  ;;  %v1107_v10 = vmul.f32 %v2283_v24, %v2283_v24 }
 0x6ec   :  { %v1122_v17 = vmul.f32 %v1106_v19, %v2281_v7  ;;  %v1123_v40 = vmul.f32 %v1107_v10, %v2283_v24 }
 0x6ee   :  { %v1138_v14 = vmul.f32 0.044715, %v1122_v17  ;;  %v1139_v9 = vmul.f32 0.044715, %v1123_v40  ;;  %v1119_v17 = vmul.f32 %v1103_v56, %v2327_v20 }
 0x6ef   :  { %v1061_v44 = vpop.f32.mrf.mxu2  ;;  %v1090_v21 = vpop.f32.mrf.mxu3 }
 0x6f0   :  { %v2295_v16 = vadd.f32 %v1061_v44, %v1007_v25  ;;  %v2298_v22 = vadd.f32 %v1090_v21, %v1007_v25  ;;  %v1154_v53 = vadd.f32 %v1138_v14, %v2281_v7  ;;  %v1155_v2 = vadd.f32 %v1139_v9, %v2283_v24 }
 0x6f1   :  { %v1135_v8 = vmul.f32 0.044715, %v1119_v17 }
 0x6f2   :  { %v1108_v47 = vmul.f32 %v2295_v16, %v2295_v16  ;;  %v1109_v12 = vmul.f32 %v2298_v22, %v2298_v22  ;;  %v1170_v44 = vmul.f32 0.7978846, %v1154_v53  ;;  %v1171_v28 = vmul.f32 0.7978846, %v1155_v2 }
 0x6f3   :  { %v1151_v56 = vadd.f32 %v1135_v8, %v2327_v20 }
 0x6f4   :  { %v1124_v52 = vmul.f32 %v1108_v47, %v2295_v16  ;;  %v1125_v50 = vmul.f32 %v1109_v12, %v2298_v22  ;;  %1504 = vtanh.f32 %v1170_v44 }
 0x6f5   :  { %1506 = vtanh.f32 %v1171_v28 }
 0x6f6   :  { %v1140_v18 = vmul.f32 0.044715, %v1124_v52  ;;  %v1141_v21 = vmul.f32 0.044715, %v1125_v50 }
 0x6f7   :  { %v1063_v48 = vpop.f32.mrf.mxu2  ;;  %v1092_v1 = vpop.f32.mrf.mxu3 }
 0x6f8   :  { %v2289_v5 = vadd.f32 %v1063_v48, %v1012_v55  ;;  %v2293_v11 = vadd.f32 %v1092_v1, %v1012_v55  ;;  %v1121_v55 = vmul.f32 %v1105_v61, %v2315_v0  ;;  %v1156_v40 = vadd.f32 %v1140_v18, %v2295_v16 }
 0x6fa   :  { %v1110_v23 = vmul.f32 %v2289_v5, %v2289_v5  ;;  %v1111_v41 = vmul.f32 %v2293_v11, %v2293_v11 }
 0x6fc   :  { %v1126_v30 = vmul.f32 %v1110_v23, %v2289_v5  ;;  %v1127_v49 = vmul.f32 %v1111_v41, %v2293_v11  ;;  %v1136_v23 = vmul.f32 0.044715, %v1120_v4  ;;  %v1505_v4 = vpop.eup %1504 }
 0x6fe   :  { %v1142_v59 = vmul.f32 0.044715, %v1126_v30  ;;  %v1143_v58 = vmul.f32 0.044715, %v1127_v49  ;;  %v1137_v30 = vmul.f32 0.044715, %v1121_v55  ;;  %v1152_v9 = vadd.f32 %v1136_v23, %v2306_v35 }
 0x6ff   :  { %v1066_v42 = vpop.f32.mrf.mxu2  ;;  %v1095_v45 = vpop.f32.mrf.mxu3 }
 0x700   :  { %v2323_v27 = vadd.f32 %v1066_v42, %v1017_v62  ;;  %v2325_v43 = vadd.f32 %v1095_v45, %v1017_v62  ;;  %v1118_v62 = vmul.f32 %v1102_v38, %v2311_v46  ;;  %v1158_v63 = vadd.f32 %v1142_v59, %v2289_v5 }
 0x701   :  { %v1159_v34 = vadd.f32 %v1143_v58, %v2293_v11  ;;  %v1172_v38 = vmul.f32 0.7978846, %v1156_v40  ;;  %v1153_v61 = vadd.f32 %v1137_v30, %v2315_v0  ;;  %v1168_v2 = vmul.f32 0.7978846, %v1152_v9 }
 0x702   :  { %v1112_v51 = vmul.f32 %v2323_v27, %v2323_v27  ;;  %v1113_v31 = vmul.f32 %v2325_v43, %v2325_v43  ;;  %v1134_v12 = vmul.f32 0.044715, %v1118_v62  ;;  %v1174_v45 = vmul.f32 0.7978846, %v1158_v63  ;;  %v1507_v62 = vpop.eup %1506 }
 0x703   :  { %v1175_v49 = vmul.f32 0.7978846, %v1159_v34  ;;  %v1202_v9 = vadd.f32 1.0, %v1505_v4 }
 0x704   :  { %v1128_v15 = vmul.f32 %v1112_v51, %v2323_v27  ;;  %v1129_v37 = vmul.f32 %v1113_v31, %v2325_v43  ;;  %v1133_v31 = vmul.f32 0.044715, %v1117_v57  ;;  %v1150_v50 = vadd.f32 %v1134_v12, %v2311_v46 }
 0x706   :  { %v1144_v32 = vmul.f32 0.044715, %v1128_v15  ;;  %v1145_v25 = vmul.f32 0.044715, %v1129_v37  ;;  %v1148_v37 = vadd.f32 %v1132_v54, %v2287_v3  ;;  %v1149_v18 = vadd.f32 %v1133_v31, %v2304_v29 }
 0x707   :  { %v1068_v13 = vpop.f32.mrf.mxu2  ;;  %v1097_v36 = vpop.f32.mrf.mxu3  ;;  %v1166_v55 = vmul.f32 0.7978846, %v1150_v50 }
 0x708   :  { %v1160_v19 = vadd.f32 %v1144_v32, %v2323_v27  ;;  %v1161_v48 = vadd.f32 %v1145_v25, %v2325_v43  ;;  %v2356_v1 = vadd.f32 %v1068_v13, %v2279_v26  ;;  %v2359_v10 = vadd.f32 %v1097_v36, %v2279_v26 }
 0x709   :  { %v1157_v26 = vadd.f32 %v1141_v21, %v2298_v22  ;;  %v1169_v32 = vmul.f32 0.7978846, %v1153_v61  ;;  %v1167_v21 = vmul.f32 0.7978846, %v1151_v56  ;;  %v1164_v63 = vmul.f32 0.7978846, %v1148_v37 }
 0x70a   :  { %v1176_v41 = vmul.f32 0.7978846, %v1160_v19  ;;  %v1114_v47 = vmul.f32 %v2356_v1, %v2356_v1  ;;  %v1115_v14 = vmul.f32 %v2359_v10, %v2359_v10  ;;  %v1177_v42 = vmul.f32 0.7978846, %v1161_v48 }
 0x70b   :  { %v1173_v53 = vmul.f32 0.7978846, %v1157_v26  ;;  %v1165_v36 = vmul.f32 0.7978846, %v1149_v18 }
 0x70c   :  { %v1130_v60 = vmul.f32 %v1114_v47, %v2356_v1  ;;  %v1131_v33 = vmul.f32 %v1115_v14, %v2359_v10  ;;  %1508 = vtanh.f32 %v1176_v41 }
 0x70d   :  { %1510 = vtanh.f32 %v1177_v42 }
 0x70e   :  { %v1146_v52 = vmul.f32 0.044715, %v1130_v60  ;;  %v1147_v51 = vmul.f32 0.044715, %v1131_v33  ;;  %1512 = vtanh.f32 %v1174_v45 }
 0x70f   :  { %1514 = vtanh.f32 %v1175_v49 }
 0x710   :  { %v1162_v59 = vadd.f32 %v1146_v52, %v2356_v1  ;;  %v1163_v15 = vadd.f32 %v1147_v51, %v2359_v10  ;;  %1516 = vtanh.f32 %v1172_v38  ;;  %v1203_v51 = vadd.f32 1.0, %v1507_v62 }
 0x711   :  { %1518 = vtanh.f32 %v1173_v53 }
 0x712   :  { %v1178_v57 = vmul.f32 0.7978846, %v1162_v59  ;;  %v1179_v58 = vmul.f32 0.7978846, %v1163_v15  ;;  %v1509_v25 = vpop.eup %1508 }
 0x713   :  { %v1511_v44 = vpop.eup %1510  ;;  %v1208_v19 = vadd.f32 1.0, %v1509_v25 }
 0x714   :  { %1520 = vtanh.f32 %v1178_v57  ;;  %v1513_v54 = vpop.eup %1512  ;;  %v1209_v17 = vadd.f32 1.0, %v1511_v44 }
 0x715   :  { %1522 = vtanh.f32 %v1179_v58  ;;  %v1515_v13 = vpop.eup %1514  ;;  %v1206_v28 = vadd.f32 1.0, %v1513_v54  ;;  %v1224_v47 = vmul.f32 0.5, %v1208_v19 }
 0x716   :  { %1524 = vtanh.f32 %v1168_v2  ;;  %v1517_v48 = vpop.eup %1516  ;;  %v1207_v40 = vadd.f32 1.0, %v1515_v13  ;;  %v1225_v26 = vmul.f32 0.5, %v1209_v17 }
 0x717   :  { %1526 = vtanh.f32 %v1169_v32  ;;  %v1519_v23 = vpop.eup %1518  ;;  %v1204_v12 = vadd.f32 1.0, %v1517_v48  ;;  %v1222_v8 = vmul.f32 0.5, %v1206_v28  ;;  %v1240_v61 = vmul.f32 %v1224_v47, %v2323_v27 }
 0x718   :  { %1528 = vtanh.f32 %v1166_v55  ;;  %v1205_v45 = vadd.f32 1.0, %v1519_v23  ;;  %v1223_v52 = vmul.f32 0.5, %v1207_v40  ;;  %v1241_v37 = vmul.f32 %v1225_v26, %v2325_v43 }
 0x719   :  { %1530 = vtanh.f32 %v1167_v21  ;;  %v1220_v50 = vmul.f32 0.5, %v1204_v12  ;;  %v1238_v18 = vmul.f32 %v1222_v8, %v2289_v5  ;;  %v1218_v32 = vmul.f32 0.5, %v1202_v9 }
 0x71a   :  { %v1521_v34 = vpop.eup %1520  ;;  %1532 = vtanh.f32 %v1164_v63  ;;  %v1221_v2 = vmul.f32 0.5, %v1205_v45  ;;  %v1239_v27 = vmul.f32 %v1223_v52, %v2293_v11  ;;  %v1219_v55 = vmul.f32 0.5, %v1203_v51 }
 0x71b   :  { %v1523_v41 = vpop.eup %1522  ;;  %1534 = vtanh.f32 %v1165_v36  ;;  %v1210_v14 = vadd.f32 1.0, %v1521_v34  ;;  %v1236_v44 = vmul.f32 %v1220_v50, %v2295_v16  ;;  %v1234_v5 = vmul.f32 %v1218_v32, %v2281_v7 }
 0x71c   :  { %v1525_v30 = vpop.eup %1524  ;;  %v1211_v42 = vadd.f32 1.0, %v1523_v41  ;;  %v1235_v48 = vmul.f32 %v1219_v55, %v2283_v24  ;;  %v1417_v24 = vld [vmem:[%s2413_s4 + $0x10] sm:$0xff] }
 0x71d   :  { %v1527_v60 = vpop.eup %1526  ;;  %v1226_v33 = vmul.f32 0.5, %v1210_v14  ;;  %v1200_v59 = vadd.f32 1.0, %v1525_v30  ;;  %v1251_v13 = vpack.c.bf16 %v1238_v18, %v1236_v44 }
 0x71e   :  { %v1529_v49 = vpop.eup %1528  ;;  %v1227_v38 = vmul.f32 0.5, %v1211_v42  ;;  %v1201_v57 = vadd.f32 1.0, %v1527_v60 }
 0x71f   :  { %v1531_v31 = vpop.eup %1530  ;;  %v1242_v53 = vmul.f32 %v1226_v33, %v2356_v1  ;;  %v1198_v62 = vadd.f32 1.0, %v1529_v49  ;;  %v1216_v21 = vmul.f32 0.5, %v1200_v59 }
 0x720   :  { %v1533_v15 = vpop.eup %1532  ;;  %v1243_v56 = vmul.f32 %v1227_v38, %v2359_v10  ;;  %v1199_v1 = vadd.f32 1.0, %v1531_v31  ;;  %v1237_v10 = vmul.f32 %v1221_v2, %v2298_v22  ;;  %v1217_v54 = vmul.f32 0.5, %v1201_v57 }
 0x721   :  { %v1535_v58 = vpop.eup %1534  ;;  %v1253_v4 = vpack.c.bf16 %v1242_v53, %v1240_v61  ;;  %v1196_v43 = vadd.f32 1.0, %v1533_v15  ;;  %v1214_v36 = vmul.f32 0.5, %v1198_v62  ;;  %v1232_v17 = vmul.f32 %v1216_v21, %v2306_v35 }
 0x722   :  { %v1254_v25 = vpack.c.bf16 %v1243_v56, %v1241_v37  ;;  %v1197_v63 = vadd.f32 1.0, %v1535_v58  ;;  %v1252_v19 = vpack.c.bf16 %v1239_v27, %v1237_v10  ;;  %v1215_v11 = vmul.f32 0.5, %v1199_v1 }
 0x723   :  { %1262 = vmatpush.bf16.msrb.mxu0 %v1253_v4  ;;  %v1212_v23 = vmul.f32 0.5, %v1196_v43  ;;  %v1233_v16 = vmul.f32 %v1217_v54, %v2315_v0  ;;  %v1249_v34 = vpack.c.bf16 %v1234_v5, %v1232_v17  ;;  %v1230_v22 = vmul.f32 %v1214_v36, %v2311_v46 }
 0x724   :  { %1275 = vmatpush.bf16.msrb.mxu1 %v1254_v25  ;;  %v1213_v28 = vmul.f32 0.5, %v1197_v63  ;;  %v1231_v41 = vmul.f32 %v1215_v11, %v2327_v20  ;;  %v1246_v0 = vpack.c.bf16 %v1417_v24, %v1417_v24 }
 0x725   :  { %v1250_v40 = vpack.c.bf16 %v1235_v48, %v1233_v16  ;;  %v1228_v7 = vmul.f32 %v1212_v23, %v2287_v3 }
 0x726   :  { %v1229_v35 = vmul.f32 %v1213_v28, %v2304_v29 }
 0x727   :  { %1263 = vmatpush.bf16.msrb.mxu0 %v1251_v13  ;;  %v1247_v47 = vpack.c.bf16 %v1230_v22, %v1228_v7 }
 0x728   :  { %1276 = vmatpush.bf16.msrb.mxu1 %v1252_v19  ;;  %v1248_v14 = vpack.c.bf16 %v1231_v41, %v1229_v35 }
 0x72b   :  { %1264 = vmatpush.bf16.msrb.mxu0 %v1249_v34 }
 0x72c   :  { %1277 = vmatpush.bf16.msrb.mxu1 %v1250_v40 }
 0x72f   :  { %1265 = vmatpush.bf16.msrb.mxu0 %v1247_v47 }
 0x730   :  { %1278 = vmatpush.bf16.msrb.mxu1 %v1248_v14 }
 0x732   :  { %1418 = vmatmul.msk.bf16.vlgmr.msrb.gmra.mxu0 %vm480_vm2, %v1246_v0 }
 0x733   :  { %1419 = vmatmul.msk.bf16.vlgmr.msrb.gmra.mxu1 %vm480_vm2, %v1246_v0 }
 0x7af   :  { %v1267_v46 = vpop.f32.mrf.mxu0 }
 0x7b0   :  { %v1284_v20 = vadd.f32 %v1267_v46, %v2237_v6  ;;  %v1280_v3 = vpop.f32.mrf.mxu1 }
 0x7b1   :  { %v1285_v12 = vadd.f32 %v1280_v3, %v2239_v39 }
 0x7b2   :  { %1286 = vst [vmem:[%s2414_s6] sm:$0xff] %v1284_v20 }
 0x7b3   :  { %1287 = vst [vmem:[%s2414_s6 + $0x8] sm:$0xff] %v1285_v12 }
 0x7b7   :  { %v1269_v29 = vpop.f32.mrf.mxu0 }
 0x7b8   :  { %v1282_v30 = vpop.f32.mrf.mxu1 }

</bundles_post_ra>
